<compile_context>
chip_gen: v7x
topology: tpu7x:2x2x1
jax: 0.10.0
libtpu: 0.0.40
codegen_flags: <defaults>
</compile_context>

<pallas_src>
import functools

import jax
import jax.numpy as jnp
from jax import lax
from jax.experimental import pallas as pl
from jax.experimental.pallas import tpu as pltpu


# ----------------------------------------------------------------------------
# Fused Pallas kernel: conv1+relu+pool1 -> conv2+relu+pool2 -> fc, per batch chunk
# ----------------------------------------------------------------------------
def fused_cnn_kernel(p1_ref, w1_ref, b1_ref, w2_ref, b2_ref, wf_ref, bf_ref,
                     o_ref, scr_ref, *, block_b):
  """One batch chunk (block_b images), everything resident in VMEM.

  p1_ref : (64*Bc, 100)  conv1 patches; rows = (pool1 tap, h-parity, w-parity,
                         image, pooled-row-block), K = (col-block jj, kh, kw)
  w1_ref : (100, 4*out1) block-diagonal conv1 weights (4 col-blocks x 25 taps)
  b1_ref : (1, 4*out1)
  w2_ref : (25, 4*out1, 4*out2) block-diagonal conv2 weights per 5x5 tap
  b2_ref : (1, 4*out2)
  wf_ref : (16*out2, ncls)  fc weights, rows permuted to the kernel's layout
  bf_ref : (1, ncls)
  o_ref  : (Bc, ncls)
  scr_ref: (4*Bc, 6, 6*out1) zero-padded, parity-split copy of pooled conv1 out
  """
  f32 = jnp.float32
  bc = block_b
  out1 = b1_ref.shape[1] // 4
  out2 = b2_ref.shape[1] // 4

  # ---- conv1: all 4 pool-1 taps and the whole chunk in one MXU matmul --------
  z1 = jnp.dot(p1_ref[...], w1_ref[...], preferred_element_type=f32)  # (64*Bc, 4*out1)
  m1 = 16 * bc
  y1 = jnp.maximum(jnp.maximum(z1[0:m1], z1[m1:2 * m1]),
                   jnp.maximum(z1[2 * m1:3 * m1], z1[3 * m1:4 * m1]))  # pool1
  y1 = jnp.maximum(y1 + b1_ref[...], 0.0)   # ReLU; rows (parity g, image, row-blk),
                                            # lanes (col-blk, channel)

  # ---- scatter pooled conv1 output into padded, parity-split VMEM scratch ----
  scr_ref[...] = jnp.zeros(scr_ref.shape, scr_ref.dtype)
  for g in range(4):                                     # g = (h parity, w parity)
    blk = y1[g * 4 * bc:(g + 1) * 4 * bc, :].reshape(bc, 4, 4 * out1)
    scr_ref[g * bc:(g + 1) * bc, 1:5, out1:5 * out1] = blk

  # ---- conv2 + pool2: 25 taps, 4 pool taps stacked along matmul M ------------
  shifted = {}
  for uh in range(6):
    ph, qh = uh % 2, uh // 2
    for uw in range(6):
      pw, qw = uw % 2, uw // 2
      g = ph * 2 + pw
      v = scr_ref[g * bc:(g + 1) * bc, qh:qh + 4, qw * out1:(qw + 4) * out1]
      shifted[(uh, uw)] = v.reshape(4 * bc, 4 * out1)    # rows (image, pooled i)

  acc = None
  for kh in range(5):
    for kw in range(5):
      x_t = jnp.concatenate(
          [shifted[(kh + dh, kw + dw)] for dh in range(2) for dw in range(2)],
          axis=0)                                        # (16*Bc, 4*out1)
      part = jnp.dot(x_t, w2_ref[kh * 5 + kw],
                     preferred_element_type=f32)         # (16*Bc, 4*out2)
      acc = part if acc is None else acc + part

  m2 = 4 * bc
  y2 = jnp.maximum(jnp.maximum(acc[0:m2], acc[m2:2 * m2]),
                   jnp.maximum(acc[2 * m2:3 * m2], acc[3 * m2:4 * m2]))  # pool2
  y2 = jnp.maximum(y2 + b2_ref[...], 0.0)   # (4*Bc, 4*out2): rows (image, i),
                                            # lanes (j, channel)

  # ---- fc: lane-concat the 4 row-blocks (tile aligned) and one matmul --------
  y2r = y2.reshape(bc, 4, 4 * out2)
  feat = jnp.concatenate([y2r[:, i, :] for i in range(4)], axis=1)  # (Bc, 16*out2)
  out = bf_ref[...] + jnp.dot(feat, wf_ref[...], preferred_element_type=f32)
  o_ref[...] = out.astype(o_ref.dtype)


# ----------------------------------------------------------------------------
# One-time parameter preparation (hoisted out of the forward pass)
# ----------------------------------------------------------------------------
def prepare_params(params):
  """Repack PyTorch-layout weights for the fused kernel. Run once."""
  w1, b1, w2, b2, wf, bf = params
  out1, cin1 = w1.shape[0], w1.shape[1]
  out2 = w2.shape[0]
  ncls = wf.shape[0]
  assert cin1 == 1, "module is defined for single-channel input"
  eye4 = jnp.eye(4, dtype=jnp.float32)

  # conv1: (kh,kw)->25 taps, block-diagonal over 4 pooled column blocks.
  w1m = jnp.transpose(w1, (2, 3, 1, 0)).reshape(25, out1)                  # (25, out1)
  w1bd = (eye4[:, None, :, None] * w1m[None, :, None, :]).reshape(100, 4 * out1)
  b1t = jnp.tile(b1, 4)[None, :]                                           # (1, 4*out1)

  # conv2: per 5x5 tap, block-diagonal over 4 pooled column blocks.
  w2t = jnp.transpose(w2, (2, 3, 1, 0)).reshape(25, out1, out2)            # (25, ci, co)
  w2bd = (eye4[None, :, None, :, None] *
          w2t[:, None, :, None, :]).reshape(25, 4 * out1, 4 * out2)
  b2t = jnp.tile(b2, 4)[None, :]                                           # (1, 4*out2)

  # fc: permute rows so it consumes the kernel's (i, j, channel) feature layout
  # (this also absorbs PyTorch's NCHW .view flatten order -> no runtime transpose).
  wfb = jnp.transpose(wf.reshape(ncls, out2, 4, 4), (2, 3, 1, 0)).reshape(16 * out2, ncls)
  bfr = bf[None, :]                                                        # (1, ncls)
  return (w1bd, b1t, w2bd, b2t, wfb, bfr)


def _pick_block_b(batch):
  """Largest divisor of batch that still gives >=2 grid steps (feeds 2 TCs on v7x)."""
  if batch <= 1:
    return 1
  for cand in range(batch // 2, 0, -1):
    if batch % cand == 0:
      return cand
  return 1


# ----------------------------------------------------------------------------
# Forward wrapper
# ----------------------------------------------------------------------------
@jax.jit
def cnn_forward(x_nchw, prepped):
  """Pallas implementation of CNN.forward. x: (B, 1, 16, 16) float32."""
  w1bd, b1t, w2bd, b2t, wfb, bfr = prepped
  batch = x_nchw.shape[0]
  assert x_nchw.shape[1:] == (1, 16, 16)
  ncls = bfr.shape[1]
  out1 = b1t.shape[1] // 4

  block_b = _pick_block_b(batch)
  nc = batch // block_b

  # conv1 patches for the whole image, packed so that rows are
  # (pool1 tap, h-parity, w-parity, image, pooled-row-block) and K = (col-block, kh, kw).
  xp = jnp.pad(x_nchw[:, 0], ((0, 0), (2, 2), (2, 2)))                     # (B, 20, 20)
  taps = [xp[:, kh:kh + 16, kw:kw + 16] for kh in range(5) for kw in range(5)]
  pat = jnp.stack(taps, axis=-1)                                           # (B,16,16,25)
  pat = pat.reshape(nc, block_b, 4, 2, 2, 4, 2, 2, 25)
  pat = pat.transpose(0, 4, 7, 3, 6, 1, 2, 5, 8)
  p1 = pat.reshape(nc, 64 * block_b, 100)

  out = pl.pallas_call(
      functools.partial(fused_cnn_kernel, block_b=block_b),
      out_shape=jax.ShapeDtypeStruct((nc, block_b, ncls), jnp.float32),
      grid=(nc,),
      in_specs=[
          pl.BlockSpec((None, 64 * block_b, 100), lambda c: (c, 0, 0)),
          pl.BlockSpec(w1bd.shape, lambda c: (0, 0)),
          pl.BlockSpec(b1t.shape, lambda c: (0, 0)),
          pl.BlockSpec(w2bd.shape, lambda c: (0, 0, 0)),
          pl.BlockSpec(b2t.shape, lambda c: (0, 0)),
          pl.BlockSpec(wfb.shape, lambda c: (0, 0)),
          pl.BlockSpec(bfr.shape, lambda c: (0, 0)),
      ],
      out_specs=pl.BlockSpec((None, block_b, ncls), lambda c: (c, 0, 0)),
      scratch_shapes=[pltpu.VMEM((4 * block_b, 6, 6 * out1), jnp.float32)],
      compiler_params=pltpu.CompilerParams(dimension_semantics=("parallel",)),
  )(p1, w1bd, b1t, w2bd, b2t, wfb, bfr)
  return out.reshape(batch, ncls)


# ----------------------------------------------------------------------------
# Pure-JAX reference (for correctness check only)
# ----------------------------------------------------------------------------
def ref_forward(x, params):
  w1, b1, w2, b2, wf, bf = params

  def conv(x, w, b):
    y = lax.conv_general_dilated(
        x, w, (1, 1), ((2, 2), (2, 2)),
        dimension_numbers=("NCHW", "OIHW", "NCHW"))
    return y + b[None, :, None, None]

  def pool(x):
    return lax.reduce_window(x, -jnp.inf, lax.max,
                             (1, 1, 2, 2), (1, 1, 2, 2), "VALID")

  y = pool(jnp.maximum(conv(x, w1, b1), 0.0))
  y = pool(jnp.maximum(conv(y, w2, b2), 0.0))
  y = y.reshape(x.shape[0], -1)
  return y @ wf.T + bf


# ----------------------------------------------------------------------------
def init_params(key, out_1=16, out_2=32, num_classes=10):
  k1, k2, k3, k4, k5, k6 = jax.random.split(key, 6)
  w1 = 0.1 * jax.random.normal(k1, (out_1, 1, 5, 5), jnp.float32)
  b1 = 0.1 * jax.random.normal(k2, (out_1,), jnp.float32)
  w2 = 0.1 * jax.random.normal(k3, (out_2, out_1, 5, 5), jnp.float32)
  b2 = 0.1 * jax.random.normal(k4, (out_2,), jnp.float32)
  wf = 0.1 * jax.random.normal(k5, (num_classes, out_2 * 4 * 4), jnp.float32)
  bf = 0.1 * jax.random.normal(k6, (num_classes,), jnp.float32)
  return (w1, b1, w2, b2, wf, bf)


if __name__ == "__main__":
  key = jax.random.PRNGKey(0)
  kx, kp = jax.random.split(key)
  # 16x16 single-channel input (the course resizes MNIST to 16x16 so that
  # fc1 sees out_2 * 4 * 4 = 512 features).
  x = jax.random.normal(kx, (2, 1, 16, 16), jnp.float32)
  params = init_params(kp)

  prepped = prepare_params(params)       # one-time weight repacking
  out = cnn_forward(x, prepped)
  out = jax.block_until_ready(out)

  ref = ref_forward(x, params)
  assert out.shape == (2, 10)
  assert jnp.allclose(out, ref, atol=1e-4, rtol=1e-4), (out, ref)

  print("KERNEL_OK")
</pallas_src>

<mosaic_0001>
module attributes {stable_mosaic.version = 11 : i64} {
  func.func @fused_cnn_kernel(%arg0: i32, %arg1: memref<1x64x100xf32, #tpu.memory_space<vmem>>, %arg2: memref<100x64xf32, #tpu.memory_space<vmem>>, %arg3: memref<1x64xf32, #tpu.memory_space<vmem>>, %arg4: memref<25x64x128xf32, #tpu.memory_space<vmem>>, %arg5: memref<1x128xf32, #tpu.memory_space<vmem>>, %arg6: memref<512x10xf32, #tpu.memory_space<vmem>>, %arg7: memref<1x10xf32, #tpu.memory_space<vmem>>, %arg8: memref<1x1x10xf32, #tpu.memory_space<vmem>>, %arg9: memref<4x6x96xf32, #tpu.memory_space<vmem>>) attributes {dimension_semantics = [#tpu.dimension_semantics<parallel>], iteration_bounds = array<i64: 2>, scalar_prefetch = 0 : i64, scratch_operands = 1 : i64, tpu.core_type = #tpu.core_type<tc>, window_params = [{transform_indices = @transform_0, window_bounds = array<i64: 1, 64, 100>}, {pipeline_mode = #tpu.pipeline_mode<synchronous>, transform_indices = @transform_1, window_bounds = array<i64: 100, 64>}, {pipeline_mode = #tpu.pipeline_mode<synchronous>, transform_indices = @transform_2, window_bounds = array<i64: 1, 64>}, {pipeline_mode = #tpu.pipeline_mode<synchronous>, transform_indices = @transform_3, window_bounds = array<i64: 25, 64, 128>}, {pipeline_mode = #tpu.pipeline_mode<synchronous>, transform_indices = @transform_4, window_bounds = array<i64: 1, 128>}, {pipeline_mode = #tpu.pipeline_mode<synchronous>, transform_indices = @transform_5, window_bounds = array<i64: 512, 10>}, {pipeline_mode = #tpu.pipeline_mode<synchronous>, transform_indices = @transform_6, window_bounds = array<i64: 1, 10>}, {transform_indices = @transform_7, window_bounds = array<i64: 1, 1, 10>}]} {
    %c0 = arith.constant 0 : index
    %c0_0 = arith.constant 0 : index
    %c0_1 = arith.constant 0 : index
    %0 = vector.load %arg1[%c0, %c0_0, %c0_1] : memref<1x64x100xf32, #tpu.memory_space<vmem>>, vector<1x64x100xf32>
    %1 = vector.shape_cast %0 : vector<1x64x100xf32> to vector<64x100xf32>
    %c0_2 = arith.constant 0 : index
    %c0_3 = arith.constant 0 : index
    %2 = vector.load %arg2[%c0_2, %c0_3] : memref<100x64xf32, #tpu.memory_space<vmem>>, vector<100x64xf32>
    %cst = arith.constant dense<0.000000e+00> : vector<64x64xf32>
    %3 = tpu.matmul %1, %2, %cst {dimension_numbers = #tpu.dot_dimension_numbers<[1], [0], [0], [1], [0, 0, 1, 1], [], []>} : vector<64x100xf32>, vector<100x64xf32>, vector<64x64xf32> -> vector<64x64xf32>
    %4 = vector.extract_strided_slice %3 {offsets = [0, 0], sizes = [16, 64], strides = [1, 1]} : vector<64x64xf32> to vector<16x64xf32>
    %5 = vector.extract_strided_slice %3 {offsets = [16, 0], sizes = [16, 64], strides = [1, 1]} : vector<64x64xf32> to vector<16x64xf32>
    %6 = arith.maximumf %4, %5 : vector<16x64xf32>
    %7 = vector.extract_strided_slice %3 {offsets = [32, 0], sizes = [16, 64], strides = [1, 1]} : vector<64x64xf32> to vector<16x64xf32>
    %8 = vector.extract_strided_slice %3 {offsets = [48, 0], sizes = [16, 64], strides = [1, 1]} : vector<64x64xf32> to vector<16x64xf32>
    %9 = arith.maximumf %7, %8 : vector<16x64xf32>
    %10 = arith.maximumf %6, %9 : vector<16x64xf32>
    %c0_4 = arith.constant 0 : index
    %c0_5 = arith.constant 0 : index
    %11 = vector.load %arg3[%c0_4, %c0_5] : memref<1x64xf32, #tpu.memory_space<vmem>>, vector<1x64xf32>
    %12 = vector.broadcast %11 : vector<1x64xf32> to vector<16x64xf32>
    %13 = arith.addf %10, %12 : vector<16x64xf32>
    %cst_6 = arith.constant 0.000000e+00 : f32
    %14 = vector.broadcast %cst_6 : f32 to vector<16x64xf32>
    %15 = arith.maximumf %13, %14 : vector<16x64xf32>
    %cst_7 = arith.constant 0.000000e+00 : f32
    %16 = vector.broadcast %cst_7 : f32 to vector<4x6x96xf32>
    %c0_8 = arith.constant 0 : index
    %c0_9 = arith.constant 0 : index
    %c0_10 = arith.constant 0 : index
    %17 = vector.load %arg9[%c0_8, %c0_9, %c0_10] : memref<4x6x96xf32, #tpu.memory_space<vmem>>, vector<4x6x96xf32>
    tpu.vector_store %arg9[%c0_8, %c0_9, %c0_10], %16 {strides = array<i32>} : memref<4x6x96xf32, #tpu.memory_space<vmem>>, vector<4x6x96xf32>,
    %18 = vector.extract_strided_slice %15 {offsets = [0, 0], sizes = [4, 64], strides = [1, 1]} : vector<16x64xf32> to vector<4x64xf32>
    %19 = vector.shape_cast %18 : vector<4x64xf32> to vector<1x4x64xf32>
    %c0_11 = arith.constant 0 : index
    %c1 = arith.constant 1 : index
    %c16 = arith.constant 16 : index
    %20 = vector.load %arg9[%c0_11, %c1, %c16] : memref<4x6x96xf32, #tpu.memory_space<vmem>>, vector<1x4x64xf32>
    tpu.vector_store %arg9[%c0_11, %c1, %c16], %19 {strides = array<i32>} : memref<4x6x96xf32, #tpu.memory_space<vmem>>, vector<1x4x64xf32>,
    %21 = vector.extract_strided_slice %15 {offsets = [4, 0], sizes = [4, 64], strides = [1, 1]} : vector<16x64xf32> to vector<4x64xf32>
    %22 = vector.shape_cast %21 : vector<4x64xf32> to vector<1x4x64xf32>
    %c1_12 = arith.constant 1 : index
    %c1_13 = arith.constant 1 : index
    %c16_14 = arith.constant 16 : index
    %23 = vector.load %arg9[%c1_12, %c1_13, %c16_14] : memref<4x6x96xf32, #tpu.memory_space<vmem>>, vector<1x4x64xf32>
    tpu.vector_store %arg9[%c1_12, %c1_13, %c16_14], %22 {strides = array<i32>} : memref<4x6x96xf32, #tpu.memory_space<vmem>>, vector<1x4x64xf32>,
    %24 = vector.extract_strided_slice %15 {offsets = [8, 0], sizes = [4, 64], strides = [1, 1]} : vector<16x64xf32> to vector<4x64xf32>
    %25 = vector.shape_cast %24 : vector<4x64xf32> to vector<1x4x64xf32>
    %c2 = arith.constant 2 : index
    %c1_15 = arith.constant 1 : index
    %c16_16 = arith.constant 16 : index
    %26 = vector.load %arg9[%c2, %c1_15, %c16_16] : memref<4x6x96xf32, #tpu.memory_space<vmem>>, vector<1x4x64xf32>
    tpu.vector_store %arg9[%c2, %c1_15, %c16_16], %25 {strides = array<i32>} : memref<4x6x96xf32, #tpu.memory_space<vmem>>, vector<1x4x64xf32>,
    %27 = vector.extract_strided_slice %15 {offsets = [12, 0], sizes = [4, 64], strides = [1, 1]} : vector<16x64xf32> to vector<4x64xf32>
    %28 = vector.shape_cast %27 : vector<4x64xf32> to vector<1x4x64xf32>
    %c3 = arith.constant 3 : index
    %c1_17 = arith.constant 1 : index
    %c16_18 = arith.constant 16 : index
    %29 = vector.load %arg9[%c3, %c1_17, %c16_18] : memref<4x6x96xf32, #tpu.memory_space<vmem>>, vector<1x4x64xf32>
    tpu.vector_store %arg9[%c3, %c1_17, %c16_18], %28 {strides = array<i32>} : memref<4x6x96xf32, #tpu.memory_space<vmem>>, vector<1x4x64xf32>,
    %c0_19 = arith.constant 0 : index
    %c0_20 = arith.constant 0 : index
    %c0_21 = arith.constant 0 : index
    %30 = vector.load %arg9[%c0_19, %c0_20, %c0_21] : memref<4x6x96xf32, #tpu.memory_space<vmem>>, vector<1x4x64xf32>
    %31 = vector.shape_cast %30 : vector<1x4x64xf32> to vector<4x64xf32>
    %c1_22 = arith.constant 1 : index
    %c0_23 = arith.constant 0 : index
    %c0_24 = arith.constant 0 : index
    %32 = vector.load %arg9[%c1_22, %c0_23, %c0_24] : memref<4x6x96xf32, #tpu.memory_space<vmem>>, vector<1x4x64xf32>
    %33 = vector.shape_cast %32 : vector<1x4x64xf32> to vector<4x64xf32>
    %c0_25 = arith.constant 0 : index
    %c0_26 = arith.constant 0 : index
    %c16_27 = arith.constant 16 : index
    %34 = vector.load %arg9[%c0_25, %c0_26, %c16_27] : memref<4x6x96xf32, #tpu.memory_space<vmem>>, vector<1x4x64xf32>
    %35 = vector.shape_cast %34 : vector<1x4x64xf32> to vector<4x64xf32>
    %c1_28 = arith.constant 1 : index
    %c0_29 = arith.constant 0 : index
    %c16_30 = arith.constant 16 : index
    %36 = vector.load %arg9[%c1_28, %c0_29, %c16_30] : memref<4x6x96xf32, #tpu.memory_space<vmem>>, vector<1x4x64xf32>
    %37 = vector.shape_cast %36 : vector<1x4x64xf32> to vector<4x64xf32>
    %c0_31 = arith.constant 0 : index
    %c0_32 = arith.constant 0 : index
    %c32 = arith.constant 32 : index
    %38 = vector.load %arg9[%c0_31, %c0_32, %c32] : memref<4x6x96xf32, #tpu.memory_space<vmem>>, vector<1x4x64xf32>
    %39 = vector.shape_cast %38 : vector<1x4x64xf32> to vector<4x64xf32>
    %c1_33 = arith.constant 1 : index
    %c0_34 = arith.constant 0 : index
    %c32_35 = arith.constant 32 : index
    %40 = vector.load %arg9[%c1_33, %c0_34, %c32_35] : memref<4x6x96xf32, #tpu.memory_space<vmem>>, vector<1x4x64xf32>
    %41 = vector.shape_cast %40 : vector<1x4x64xf32> to vector<4x64xf32>
    %c2_36 = arith.constant 2 : index
    %c0_37 = arith.constant 0 : index
    %c0_38 = arith.constant 0 : index
    %42 = vector.load %arg9[%c2_36, %c0_37, %c0_38] : memref<4x6x96xf32, #tpu.memory_space<vmem>>, vector<1x4x64xf32>
    %43 = vector.shape_cast %42 : vector<1x4x64xf32> to vector<4x64xf32>
    %c3_39 = arith.constant 3 : index
    %c0_40 = arith.constant 0 : index
    %c0_41 = arith.constant 0 : index
    %44 = vector.load %arg9[%c3_39, %c0_40, %c0_41] : memref<4x6x96xf32, #tpu.memory_space<vmem>>, vector<1x4x64xf32>
    %45 = vector.shape_cast %44 : vector<1x4x64xf32> to vector<4x64xf32>
    %c2_42 = arith.constant 2 : index
    %c0_43 = arith.constant 0 : index
    %c16_44 = arith.constant 16 : index
    %46 = vector.load %arg9[%c2_42, %c0_43, %c16_44] : memref<4x6x96xf32, #tpu.memory_space<vmem>>, vector<1x4x64xf32>
    %47 = vector.shape_cast %46 : vector<1x4x64xf32> to vector<4x64xf32>
    %c3_45 = arith.constant 3 : index
    %c0_46 = arith.constant 0 : index
    %c16_47 = arith.constant 16 : index
    %48 = vector.load %arg9[%c3_45, %c0_46, %c16_47] : memref<4x6x96xf32, #tpu.memory_space<vmem>>, vector<1x4x64xf32>
    %49 = vector.shape_cast %48 : vector<1x4x64xf32> to vector<4x64xf32>
    %c2_48 = arith.constant 2 : index
    %c0_49 = arith.constant 0 : index
    %c32_50 = arith.constant 32 : index
    %50 = vector.load %arg9[%c2_48, %c0_49, %c32_50] : memref<4x6x96xf32, #tpu.memory_space<vmem>>, vector<1x4x64xf32>
    %51 = vector.shape_cast %50 : vector<1x4x64xf32> to vector<4x64xf32>
    %c3_51 = arith.constant 3 : index
    %c0_52 = arith.constant 0 : index
    %c32_53 = arith.constant 32 : index
    %52 = vector.load %arg9[%c3_51, %c0_52, %c32_53] : memref<4x6x96xf32, #tpu.memory_space<vmem>>, vector<1x4x64xf32>
    %53 = vector.shape_cast %52 : vector<1x4x64xf32> to vector<4x64xf32>
    %c0_54 = arith.constant 0 : index
    %c1_55 = arith.constant 1 : index
    %c0_56 = arith.constant 0 : index
    %54 = vector.load %arg9[%c0_54, %c1_55, %c0_56] : memref<4x6x96xf32, #tpu.memory_space<vmem>>, vector<1x4x64xf32>
    %55 = vector.shape_cast %54 : vector<1x4x64xf32> to vector<4x64xf32>
    %c1_57 = arith.constant 1 : index
    %c1_58 = arith.constant 1 : index
    %c0_59 = arith.constant 0 : index
    %56 = vector.load %arg9[%c1_57, %c1_58, %c0_59] : memref<4x6x96xf32, #tpu.memory_space<vmem>>, vector<1x4x64xf32>
    %57 = vector.shape_cast %56 : vector<1x4x64xf32> to vector<4x64xf32>
    %c0_60 = arith.constant 0 : index
    %c1_61 = arith.constant 1 : index
    %c16_62 = arith.constant 16 : index
    %58 = vector.load %arg9[%c0_60, %c1_61, %c16_62] : memref<4x6x96xf32, #tpu.memory_space<vmem>>, vector<1x4x64xf32>
    %59 = vector.shape_cast %58 : vector<1x4x64xf32> to vector<4x64xf32>
    %c1_63 = arith.constant 1 : index
    %c1_64 = arith.constant 1 : index
    %c16_65 = arith.constant 16 : index
    %60 = vector.load %arg9[%c1_63, %c1_64, %c16_65] : memref<4x6x96xf32, #tpu.memory_space<vmem>>, vector<1x4x64xf32>
    %61 = vector.shape_cast %60 : vector<1x4x64xf32> to vector<4x64xf32>
    %c0_66 = arith.constant 0 : index
    %c1_67 = arith.constant 1 : index
    %c32_68 = arith.constant 32 : index
    %62 = vector.load %arg9[%c0_66, %c1_67, %c32_68] : memref<4x6x96xf32, #tpu.memory_space<vmem>>, vector<1x4x64xf32>
    %63 = vector.shape_cast %62 : vector<1x4x64xf32> to vector<4x64xf32>
    %c1_69 = arith.constant 1 : index
    %c1_70 = arith.constant 1 : index
    %c32_71 = arith.constant 32 : index
    %64 = vector.load %arg9[%c1_69, %c1_70, %c32_71] : memref<4x6x96xf32, #tpu.memory_space<vmem>>, vector<1x4x64xf32>
    %65 = vector.shape_cast %64 : vector<1x4x64xf32> to vector<4x64xf32>
    %c2_72 = arith.constant 2 : index
    %c1_73 = arith.constant 1 : index
    %c0_74 = arith.constant 0 : index
    %66 = vector.load %arg9[%c2_72, %c1_73, %c0_74] : memref<4x6x96xf32, #tpu.memory_space<vmem>>, vector<1x4x64xf32>
    %67 = vector.shape_cast %66 : vector<1x4x64xf32> to vector<4x64xf32>
    %c3_75 = arith.constant 3 : index
    %c1_76 = arith.constant 1 : index
    %c0_77 = arith.constant 0 : index
    %68 = vector.load %arg9[%c3_75, %c1_76, %c0_77] : memref<4x6x96xf32, #tpu.memory_space<vmem>>, vector<1x4x64xf32>
    %69 = vector.shape_cast %68 : vector<1x4x64xf32> to vector<4x64xf32>
    %c2_78 = arith.constant 2 : index
    %c1_79 = arith.constant 1 : index
    %c16_80 = arith.constant 16 : index
    %70 = vector.load %arg9[%c2_78, %c1_79, %c16_80] : memref<4x6x96xf32, #tpu.memory_space<vmem>>, vector<1x4x64xf32>
    %71 = vector.shape_cast %70 : vector<1x4x64xf32> to vector<4x64xf32>
    %c3_81 = arith.constant 3 : index
    %c1_82 = arith.constant 1 : index
    %c16_83 = arith.constant 16 : index
    %72 = vector.load %arg9[%c3_81, %c1_82, %c16_83] : memref<4x6x96xf32, #tpu.memory_space<vmem>>, vector<1x4x64xf32>
    %73 = vector.shape_cast %72 : vector<1x4x64xf32> to vector<4x64xf32>
    %c2_84 = arith.constant 2 : index
    %c1_85 = arith.constant 1 : index
    %c32_86 = arith.constant 32 : index
    %74 = vector.load %arg9[%c2_84, %c1_85, %c32_86] : memref<4x6x96xf32, #tpu.memory_space<vmem>>, vector<1x4x64xf32>
    %75 = vector.shape_cast %74 : vector<1x4x64xf32> to vector<4x64xf32>
    %c3_87 = arith.constant 3 : index
    %c1_88 = arith.constant 1 : index
    %c32_89 = arith.constant 32 : index
    %76 = vector.load %arg9[%c3_87, %c1_88, %c32_89] : memref<4x6x96xf32, #tpu.memory_space<vmem>>, vector<1x4x64xf32>
    %77 = vector.shape_cast %76 : vector<1x4x64xf32> to vector<4x64xf32>
    %c0_90 = arith.constant 0 : index
    %c2_91 = arith.constant 2 : index
    %c0_92 = arith.constant 0 : index
    %78 = vector.load %arg9[%c0_90, %c2_91, %c0_92] : memref<4x6x96xf32, #tpu.memory_space<vmem>>, vector<1x4x64xf32>
    %79 = vector.shape_cast %78 : vector<1x4x64xf32> to vector<4x64xf32>
    %c1_93 = arith.constant 1 : index
    %c2_94 = arith.constant 2 : index
    %c0_95 = arith.constant 0 : index
    %80 = vector.load %arg9[%c1_93, %c2_94, %c0_95] : memref<4x6x96xf32, #tpu.memory_space<vmem>>, vector<1x4x64xf32>
    %81 = vector.shape_cast %80 : vector<1x4x64xf32> to vector<4x64xf32>
    %c0_96 = arith.constant 0 : index
    %c2_97 = arith.constant 2 : index
    %c16_98 = arith.constant 16 : index
    %82 = vector.load %arg9[%c0_96, %c2_97, %c16_98] : memref<4x6x96xf32, #tpu.memory_space<vmem>>, vector<1x4x64xf32>
    %83 = vector.shape_cast %82 : vector<1x4x64xf32> to vector<4x64xf32>
    %c1_99 = arith.constant 1 : index
    %c2_100 = arith.constant 2 : index
    %c16_101 = arith.constant 16 : index
    %84 = vector.load %arg9[%c1_99, %c2_100, %c16_101] : memref<4x6x96xf32, #tpu.memory_space<vmem>>, vector<1x4x64xf32>
    %85 = vector.shape_cast %84 : vector<1x4x64xf32> to vector<4x64xf32>
    %c0_102 = arith.constant 0 : index
    %c2_103 = arith.constant 2 : index
    %c32_104 = arith.constant 32 : index
    %86 = vector.load %arg9[%c0_102, %c2_103, %c32_104] : memref<4x6x96xf32, #tpu.memory_space<vmem>>, vector<1x4x64xf32>
    %87 = vector.shape_cast %86 : vector<1x4x64xf32> to vector<4x64xf32>
    %c1_105 = arith.constant 1 : index
    %c2_106 = arith.constant 2 : index
    %c32_107 = arith.constant 32 : index
    %88 = vector.load %arg9[%c1_105, %c2_106, %c32_107] : memref<4x6x96xf32, #tpu.memory_space<vmem>>, vector<1x4x64xf32>
    %89 = vector.shape_cast %88 : vector<1x4x64xf32> to vector<4x64xf32>
    %c2_108 = arith.constant 2 : index
    %c2_109 = arith.constant 2 : index
    %c0_110 = arith.constant 0 : index
    %90 = vector.load %arg9[%c2_108, %c2_109, %c0_110] : memref<4x6x96xf32, #tpu.memory_space<vmem>>, vector<1x4x64xf32>
    %91 = vector.shape_cast %90 : vector<1x4x64xf32> to vector<4x64xf32>
    %c3_111 = arith.constant 3 : index
    %c2_112 = arith.constant 2 : index
    %c0_113 = arith.constant 0 : index
    %92 = vector.load %arg9[%c3_111, %c2_112, %c0_113] : memref<4x6x96xf32, #tpu.memory_space<vmem>>, vector<1x4x64xf32>
    %93 = vector.shape_cast %92 : vector<1x4x64xf32> to vector<4x64xf32>
    %c2_114 = arith.constant 2 : index
    %c2_115 = arith.constant 2 : index
    %c16_116 = arith.constant 16 : index
    %94 = vector.load %arg9[%c2_114, %c2_115, %c16_116] : memref<4x6x96xf32, #tpu.memory_space<vmem>>, vector<1x4x64xf32>
    %95 = vector.shape_cast %94 : vector<1x4x64xf32> to vector<4x64xf32>
    %c3_117 = arith.constant 3 : index
    %c2_118 = arith.constant 2 : index
    %c16_119 = arith.constant 16 : index
    %96 = vector.load %arg9[%c3_117, %c2_118, %c16_119] : memref<4x6x96xf32, #tpu.memory_space<vmem>>, vector<1x4x64xf32>
    %97 = vector.shape_cast %96 : vector<1x4x64xf32> to vector<4x64xf32>
    %c2_120 = arith.constant 2 : index
    %c2_121 = arith.constant 2 : index
    %c32_122 = arith.constant 32 : index
    %98 = vector.load %arg9[%c2_120, %c2_121, %c32_122] : memref<4x6x96xf32, #tpu.memory_space<vmem>>, vector<1x4x64xf32>
    %99 = vector.shape_cast %98 : vector<1x4x64xf32> to vector<4x64xf32>
    %c3_123 = arith.constant 3 : index
    %c2_124 = arith.constant 2 : index
    %c32_125 = arith.constant 32 : index
    %100 = vector.load %arg9[%c3_123, %c2_124, %c32_125] : memref<4x6x96xf32, #tpu.memory_space<vmem>>, vector<1x4x64xf32>
    %101 = vector.shape_cast %100 : vector<1x4x64xf32> to vector<4x64xf32>
    %102 = tpu.concatenate %31, %33, %43, %45 in 0 : vector<4x64xf32>, vector<4x64xf32>, vector<4x64xf32>, vector<4x64xf32> -> vector<16x64xf32>
    %c0_126 = arith.constant 0 : index
    %c0_127 = arith.constant 0 : index
    %c0_128 = arith.constant 0 : index
    %103 = vector.load %arg4[%c0_126, %c0_127, %c0_128] : memref<25x64x128xf32, #tpu.memory_space<vmem>>, vector<1x64x128xf32>
    %104 = vector.shape_cast %103 : vector<1x64x128xf32> to vector<64x128xf32>
    %cst_129 = arith.constant dense<0.000000e+00> : vector<16x128xf32>
    %105 = tpu.matmul %102, %104, %cst_129 {dimension_numbers = #tpu.dot_dimension_numbers<[1], [0], [0], [1], [0, 0, 1, 1], [], []>} : vector<16x64xf32>, vector<64x128xf32>, vector<16x128xf32> -> vector<16x128xf32>
    %106 = tpu.concatenate %33, %35, %45, %47 in 0 : vector<4x64xf32>, vector<4x64xf32>, vector<4x64xf32>, vector<4x64xf32> -> vector<16x64xf32>
    %c1_130 = arith.constant 1 : index
    %c0_131 = arith.constant 0 : index
    %c0_132 = arith.constant 0 : index
    %107 = vector.load %arg4[%c1_130, %c0_131, %c0_132] : memref<25x64x128xf32, #tpu.memory_space<vmem>>, vector<1x64x128xf32>
    %108 = vector.shape_cast %107 : vector<1x64x128xf32> to vector<64x128xf32>
    %cst_133 = arith.constant dense<0.000000e+00> : vector<16x128xf32>
    %109 = tpu.matmul %106, %108, %cst_133 {dimension_numbers = #tpu.dot_dimension_numbers<[1], [0], [0], [1], [0, 0, 1, 1], [], []>} : vector<16x64xf32>, vector<64x128xf32>, vector<16x128xf32> -> vector<16x128xf32>
    %110 = arith.addf %105, %109 : vector<16x128xf32>
    %111 = tpu.concatenate %35, %37, %47, %49 in 0 : vector<4x64xf32>, vector<4x64xf32>, vector<4x64xf32>, vector<4x64xf32> -> vector<16x64xf32>
    %c2_134 = arith.constant 2 : index
    %c0_135 = arith.constant 0 : index
    %c0_136 = arith.constant 0 : index
    %112 = vector.load %arg4[%c2_134, %c0_135, %c0_136] : memref<25x64x128xf32, #tpu.memory_space<vmem>>, vector<1x64x128xf32>
    %113 = vector.shape_cast %112 : vector<1x64x128xf32> to vector<64x128xf32>
    %cst_137 = arith.constant dense<0.000000e+00> : vector<16x128xf32>
    %114 = tpu.matmul %111, %113, %cst_137 {dimension_numbers = #tpu.dot_dimension_numbers<[1], [0], [0], [1], [0, 0, 1, 1], [], []>} : vector<16x64xf32>, vector<64x128xf32>, vector<16x128xf32> -> vector<16x128xf32>
    %115 = arith.addf %110, %114 : vector<16x128xf32>
    %116 = tpu.concatenate %37, %39, %49, %51 in 0 : vector<4x64xf32>, vector<4x64xf32>, vector<4x64xf32>, vector<4x64xf32> -> vector<16x64xf32>
    %c3_138 = arith.constant 3 : index
    %c0_139 = arith.constant 0 : index
    %c0_140 = arith.constant 0 : index
    %117 = vector.load %arg4[%c3_138, %c0_139, %c0_140] : memref<25x64x128xf32, #tpu.memory_space<vmem>>, vector<1x64x128xf32>
    %118 = vector.shape_cast %117 : vector<1x64x128xf32> to vector<64x128xf32>
    %cst_141 = arith.constant dense<0.000000e+00> : vector<16x128xf32>
    %119 = tpu.matmul %116, %118, %cst_141 {dimension_numbers = #tpu.dot_dimension_numbers<[1], [0], [0], [1], [0, 0, 1, 1], [], []>} : vector<16x64xf32>, vector<64x128xf32>, vector<16x128xf32> -> vector<16x128xf32>
    %120 = arith.addf %115, %119 : vector<16x128xf32>
    %121 = tpu.concatenate %39, %41, %51, %53 in 0 : vector<4x64xf32>, vector<4x64xf32>, vector<4x64xf32>, vector<4x64xf32> -> vector<16x64xf32>
    %c4 = arith.constant 4 : index
    %c0_142 = arith.constant 0 : index
    %c0_143 = arith.constant 0 : index
    %122 = vector.load %arg4[%c4, %c0_142, %c0_143] : memref<25x64x128xf32, #tpu.memory_space<vmem>>, vector<1x64x128xf32>
    %123 = vector.shape_cast %122 : vector<1x64x128xf32> to vector<64x128xf32>
    %cst_144 = arith.constant dense<0.000000e+00> : vector<16x128xf32>
    %124 = tpu.matmul %121, %123, %cst_144 {dimension_numbers = #tpu.dot_dimension_numbers<[1], [0], [0], [1], [0, 0, 1, 1], [], []>} : vector<16x64xf32>, vector<64x128xf32>, vector<16x128xf32> -> vector<16x128xf32>
    %125 = arith.addf %120, %124 : vector<16x128xf32>
    %126 = tpu.concatenate %43, %45, %55, %57 in 0 : vector<4x64xf32>, vector<4x64xf32>, vector<4x64xf32>, vector<4x64xf32> -> vector<16x64xf32>
    %c5 = arith.constant 5 : index
    %c0_145 = arith.constant 0 : index
    %c0_146 = arith.constant 0 : index
    %127 = vector.load %arg4[%c5, %c0_145, %c0_146] : memref<25x64x128xf32, #tpu.memory_space<vmem>>, vector<1x64x128xf32>
    %128 = vector.shape_cast %127 : vector<1x64x128xf32> to vector<64x128xf32>
    %cst_147 = arith.constant dense<0.000000e+00> : vector<16x128xf32>
    %129 = tpu.matmul %126, %128, %cst_147 {dimension_numbers = #tpu.dot_dimension_numbers<[1], [0], [0], [1], [0, 0, 1, 1], [], []>} : vector<16x64xf32>, vector<64x128xf32>, vector<16x128xf32> -> vector<16x128xf32>
    %130 = arith.addf %125, %129 : vector<16x128xf32>
    %131 = tpu.concatenate %45, %47, %57, %59 in 0 : vector<4x64xf32>, vector<4x64xf32>, vector<4x64xf32>, vector<4x64xf32> -> vector<16x64xf32>
    %c6 = arith.constant 6 : index
    %c0_148 = arith.constant 0 : index
    %c0_149 = arith.constant 0 : index
    %132 = vector.load %arg4[%c6, %c0_148, %c0_149] : memref<25x64x128xf32, #tpu.memory_space<vmem>>, vector<1x64x128xf32>
    %133 = vector.shape_cast %132 : vector<1x64x128xf32> to vector<64x128xf32>
    %cst_150 = arith.constant dense<0.000000e+00> : vector<16x128xf32>
    %134 = tpu.matmul %131, %133, %cst_150 {dimension_numbers = #tpu.dot_dimension_numbers<[1], [0], [0], [1], [0, 0, 1, 1], [], []>} : vector<16x64xf32>, vector<64x128xf32>, vector<16x128xf32> -> vector<16x128xf32>
    %135 = arith.addf %130, %134 : vector<16x128xf32>
    %136 = tpu.concatenate %47, %49, %59, %61 in 0 : vector<4x64xf32>, vector<4x64xf32>, vector<4x64xf32>, vector<4x64xf32> -> vector<16x64xf32>
    %c7 = arith.constant 7 : index
    %c0_151 = arith.constant 0 : index
    %c0_152 = arith.constant 0 : index
    %137 = vector.load %arg4[%c7, %c0_151, %c0_152] : memref<25x64x128xf32, #tpu.memory_space<vmem>>, vector<1x64x128xf32>
    %138 = vector.shape_cast %137 : vector<1x64x128xf32> to vector<64x128xf32>
    %cst_153 = arith.constant dense<0.000000e+00> : vector<16x128xf32>
    %139 = tpu.matmul %136, %138, %cst_153 {dimension_numbers = #tpu.dot_dimension_numbers<[1], [0], [0], [1], [0, 0, 1, 1], [], []>} : vector<16x64xf32>, vector<64x128xf32>, vector<16x128xf32> -> vector<16x128xf32>
    %140 = arith.addf %135, %139 : vector<16x128xf32>
    %141 = tpu.concatenate %49, %51, %61, %63 in 0 : vector<4x64xf32>, vector<4x64xf32>, vector<4x64xf32>, vector<4x64xf32> -> vector<16x64xf32>
    %c8 = arith.constant 8 : index
    %c0_154 = arith.constant 0 : index
    %c0_155 = arith.constant 0 : index
    %142 = vector.load %arg4[%c8, %c0_154, %c0_155] : memref<25x64x128xf32, #tpu.memory_space<vmem>>, vector<1x64x128xf32>
    %143 = vector.shape_cast %142 : vector<1x64x128xf32> to vector<64x128xf32>
    %cst_156 = arith.constant dense<0.000000e+00> : vector<16x128xf32>
    %144 = tpu.matmul %141, %143, %cst_156 {dimension_numbers = #tpu.dot_dimension_numbers<[1], [0], [0], [1], [0, 0, 1, 1], [], []>} : vector<16x64xf32>, vector<64x128xf32>, vector<16x128xf32> -> vector<16x128xf32>
    %145 = arith.addf %140, %144 : vector<16x128xf32>
    %146 = tpu.concatenate %51, %53, %63, %65 in 0 : vector<4x64xf32>, vector<4x64xf32>, vector<4x64xf32>, vector<4x64xf32> -> vector<16x64xf32>
    %c9 = arith.constant 9 : index
    %c0_157 = arith.constant 0 : index
    %c0_158 = arith.constant 0 : index
    %147 = vector.load %arg4[%c9, %c0_157, %c0_158] : memref<25x64x128xf32, #tpu.memory_space<vmem>>, vector<1x64x128xf32>
    %148 = vector.shape_cast %147 : vector<1x64x128xf32> to vector<64x128xf32>
    %cst_159 = arith.constant dense<0.000000e+00> : vector<16x128xf32>
    %149 = tpu.matmul %146, %148, %cst_159 {dimension_numbers = #tpu.dot_dimension_numbers<[1], [0], [0], [1], [0, 0, 1, 1], [], []>} : vector<16x64xf32>, vector<64x128xf32>, vector<16x128xf32> -> vector<16x128xf32>
    %150 = arith.addf %145, %149 : vector<16x128xf32>
    %151 = tpu.concatenate %55, %57, %67, %69 in 0 : vector<4x64xf32>, vector<4x64xf32>, vector<4x64xf32>, vector<4x64xf32> -> vector<16x64xf32>
    %c10 = arith.constant 10 : index
    %c0_160 = arith.constant 0 : index
    %c0_161 = arith.constant 0 : index
    %152 = vector.load %arg4[%c10, %c0_160, %c0_161] : memref<25x64x128xf32, #tpu.memory_space<vmem>>, vector<1x64x128xf32>
    %153 = vector.shape_cast %152 : vector<1x64x128xf32> to vector<64x128xf32>
    %cst_162 = arith.constant dense<0.000000e+00> : vector<16x128xf32>
    %154 = tpu.matmul %151, %153, %cst_162 {dimension_numbers = #tpu.dot_dimension_numbers<[1], [0], [0], [1], [0, 0, 1, 1], [], []>} : vector<16x64xf32>, vector<64x128xf32>, vector<16x128xf32> -> vector<16x128xf32>
    %155 = arith.addf %150, %154 : vector<16x128xf32>
    %156 = tpu.concatenate %57, %59, %69, %71 in 0 : vector<4x64xf32>, vector<4x64xf32>, vector<4x64xf32>, vector<4x64xf32> -> vector<16x64xf32>
    %c11 = arith.constant 11 : index
    %c0_163 = arith.constant 0 : index
    %c0_164 = arith.constant 0 : index
    %157 = vector.load %arg4[%c11, %c0_163, %c0_164] : memref<25x64x128xf32, #tpu.memory_space<vmem>>, vector<1x64x128xf32>
    %158 = vector.shape_cast %157 : vector<1x64x128xf32> to vector<64x128xf32>
    %cst_165 = arith.constant dense<0.000000e+00> : vector<16x128xf32>
    %159 = tpu.matmul %156, %158, %cst_165 {dimension_numbers = #tpu.dot_dimension_numbers<[1], [0], [0], [1], [0, 0, 1, 1], [], []>} : vector<16x64xf32>, vector<64x128xf32>, vector<16x128xf32> -> vector<16x128xf32>
    %160 = arith.addf %155, %159 : vector<16x128xf32>
    %161 = tpu.concatenate %59, %61, %71, %73 in 0 : vector<4x64xf32>, vector<4x64xf32>, vector<4x64xf32>, vector<4x64xf32> -> vector<16x64xf32>
    %c12 = arith.constant 12 : index
    %c0_166 = arith.constant 0 : index
    %c0_167 = arith.constant 0 : index
    %162 = vector.load %arg4[%c12, %c0_166, %c0_167] : memref<25x64x128xf32, #tpu.memory_space<vmem>>, vector<1x64x128xf32>
    %163 = vector.shape_cast %162 : vector<1x64x128xf32> to vector<64x128xf32>
    %cst_168 = arith.constant dense<0.000000e+00> : vector<16x128xf32>
    %164 = tpu.matmul %161, %163, %cst_168 {dimension_numbers = #tpu.dot_dimension_numbers<[1], [0], [0], [1], [0, 0, 1, 1], [], []>} : vector<16x64xf32>, vector<64x128xf32>, vector<16x128xf32> -> vector<16x128xf32>
    %165 = arith.addf %160, %164 : vector<16x128xf32>
    %166 = tpu.concatenate %61, %63, %73, %75 in 0 : vector<4x64xf32>, vector<4x64xf32>, vector<4x64xf32>, vector<4x64xf32> -> vector<16x64xf32>
    %c13 = arith.constant 13 : index
    %c0_169 = arith.constant 0 : index
    %c0_170 = arith.constant 0 : index
    %167 = vector.load %arg4[%c13, %c0_169, %c0_170] : memref<25x64x128xf32, #tpu.memory_space<vmem>>, vector<1x64x128xf32>
    %168 = vector.shape_cast %167 : vector<1x64x128xf32> to vector<64x128xf32>
    %cst_171 = arith.constant dense<0.000000e+00> : vector<16x128xf32>
    %169 = tpu.matmul %166, %168, %cst_171 {dimension_numbers = #tpu.dot_dimension_numbers<[1], [0], [0], [1], [0, 0, 1, 1], [], []>} : vector<16x64xf32>, vector<64x128xf32>, vector<16x128xf32> -> vector<16x128xf32>
    %170 = arith.addf %165, %169 : vector<16x128xf32>
    %171 = tpu.concatenate %63, %65, %75, %77 in 0 : vector<4x64xf32>, vector<4x64xf32>, vector<4x64xf32>, vector<4x64xf32> -> vector<16x64xf32>
    %c14 = arith.constant 14 : index
    %c0_172 = arith.constant 0 : index
    %c0_173 = arith.constant 0 : index
    %172 = vector.load %arg4[%c14, %c0_172, %c0_173] : memref<25x64x128xf32, #tpu.memory_space<vmem>>, vector<1x64x128xf32>
    %173 = vector.shape_cast %172 : vector<1x64x128xf32> to vector<64x128xf32>
    %cst_174 = arith.constant dense<0.000000e+00> : vector<16x128xf32>
    %174 = tpu.matmul %171, %173, %cst_174 {dimension_numbers = #tpu.dot_dimension_numbers<[1], [0], [0], [1], [0, 0, 1, 1], [], []>} : vector<16x64xf32>, vector<64x128xf32>, vector<16x128xf32> -> vector<16x128xf32>
    %175 = arith.addf %170, %174 : vector<16x128xf32>
    %176 = tpu.concatenate %67, %69, %79, %81 in 0 : vector<4x64xf32>, vector<4x64xf32>, vector<4x64xf32>, vector<4x64xf32> -> vector<16x64xf32>
    %c15 = arith.constant 15 : index
    %c0_175 = arith.constant 0 : index
    %c0_176 = arith.constant 0 : index
    %177 = vector.load %arg4[%c15, %c0_175, %c0_176] : memref<25x64x128xf32, #tpu.memory_space<vmem>>, vector<1x64x128xf32>
    %178 = vector.shape_cast %177 : vector<1x64x128xf32> to vector<64x128xf32>
    %cst_177 = arith.constant dense<0.000000e+00> : vector<16x128xf32>
    %179 = tpu.matmul %176, %178, %cst_177 {dimension_numbers = #tpu.dot_dimension_numbers<[1], [0], [0], [1], [0, 0, 1, 1], [], []>} : vector<16x64xf32>, vector<64x128xf32>, vector<16x128xf32> -> vector<16x128xf32>
    %180 = arith.addf %175, %179 : vector<16x128xf32>
    %181 = tpu.concatenate %69, %71, %81, %83 in 0 : vector<4x64xf32>, vector<4x64xf32>, vector<4x64xf32>, vector<4x64xf32> -> vector<16x64xf32>
    %c16_178 = arith.constant 16 : index
    %c0_179 = arith.constant 0 : index
    %c0_180 = arith.constant 0 : index
    %182 = vector.load %arg4[%c16_178, %c0_179, %c0_180] : memref<25x64x128xf32, #tpu.memory_space<vmem>>, vector<1x64x128xf32>
    %183 = vector.shape_cast %182 : vector<1x64x128xf32> to vector<64x128xf32>
    %cst_181 = arith.constant dense<0.000000e+00> : vector<16x128xf32>
    %184 = tpu.matmul %181, %183, %cst_181 {dimension_numbers = #tpu.dot_dimension_numbers<[1], [0], [0], [1], [0, 0, 1, 1], [], []>} : vector<16x64xf32>, vector<64x128xf32>, vector<16x128xf32> -> vector<16x128xf32>
    %185 = arith.addf %180, %184 : vector<16x128xf32>
    %186 = tpu.concatenate %71, %73, %83, %85 in 0 : vector<4x64xf32>, vector<4x64xf32>, vector<4x64xf32>, vector<4x64xf32> -> vector<16x64xf32>
    %c17 = arith.constant 17 : index
    %c0_182 = arith.constant 0 : index
    %c0_183 = arith.constant 0 : index
    %187 = vector.load %arg4[%c17, %c0_182, %c0_183] : memref<25x64x128xf32, #tpu.memory_space<vmem>>, vector<1x64x128xf32>
    %188 = vector.shape_cast %187 : vector<1x64x128xf32> to vector<64x128xf32>
    %cst_184 = arith.constant dense<0.000000e+00> : vector<16x128xf32>
    %189 = tpu.matmul %186, %188, %cst_184 {dimension_numbers = #tpu.dot_dimension_numbers<[1], [0], [0], [1], [0, 0, 1, 1], [], []>} : vector<16x64xf32>, vector<64x128xf32>, vector<16x128xf32> -> vector<16x128xf32>
    %190 = arith.addf %185, %189 : vector<16x128xf32>
    %191 = tpu.concatenate %73, %75, %85, %87 in 0 : vector<4x64xf32>, vector<4x64xf32>, vector<4x64xf32>, vector<4x64xf32> -> vector<16x64xf32>
    %c18 = arith.constant 18 : index
    %c0_185 = arith.constant 0 : index
    %c0_186 = arith.constant 0 : index
    %192 = vector.load %arg4[%c18, %c0_185, %c0_186] : memref<25x64x128xf32, #tpu.memory_space<vmem>>, vector<1x64x128xf32>
    %193 = vector.shape_cast %192 : vector<1x64x128xf32> to vector<64x128xf32>
    %cst_187 = arith.constant dense<0.000000e+00> : vector<16x128xf32>
    %194 = tpu.matmul %191, %193, %cst_187 {dimension_numbers = #tpu.dot_dimension_numbers<[1], [0], [0], [1], [0, 0, 1, 1], [], []>} : vector<16x64xf32>, vector<64x128xf32>, vector<16x128xf32> -> vector<16x128xf32>
    %195 = arith.addf %190, %194 : vector<16x128xf32>
    %196 = tpu.concatenate %75, %77, %87, %89 in 0 : vector<4x64xf32>, vector<4x64xf32>, vector<4x64xf32>, vector<4x64xf32> -> vector<16x64xf32>
    %c19 = arith.constant 19 : index
    %c0_188 = arith.constant 0 : index
    %c0_189 = arith.constant 0 : index
    %197 = vector.load %arg4[%c19, %c0_188, %c0_189] : memref<25x64x128xf32, #tpu.memory_space<vmem>>, vector<1x64x128xf32>
    %198 = vector.shape_cast %197 : vector<1x64x128xf32> to vector<64x128xf32>
    %cst_190 = arith.constant dense<0.000000e+00> : vector<16x128xf32>
    %199 = tpu.matmul %196, %198, %cst_190 {dimension_numbers = #tpu.dot_dimension_numbers<[1], [0], [0], [1], [0, 0, 1, 1], [], []>} : vector<16x64xf32>, vector<64x128xf32>, vector<16x128xf32> -> vector<16x128xf32>
    %200 = arith.addf %195, %199 : vector<16x128xf32>
    %201 = tpu.concatenate %79, %81, %91, %93 in 0 : vector<4x64xf32>, vector<4x64xf32>, vector<4x64xf32>, vector<4x64xf32> -> vector<16x64xf32>
    %c20 = arith.constant 20 : index
    %c0_191 = arith.constant 0 : index
    %c0_192 = arith.constant 0 : index
    %202 = vector.load %arg4[%c20, %c0_191, %c0_192] : memref<25x64x128xf32, #tpu.memory_space<vmem>>, vector<1x64x128xf32>
    %203 = vector.shape_cast %202 : vector<1x64x128xf32> to vector<64x128xf32>
    %cst_193 = arith.constant dense<0.000000e+00> : vector<16x128xf32>
    %204 = tpu.matmul %201, %203, %cst_193 {dimension_numbers = #tpu.dot_dimension_numbers<[1], [0], [0], [1], [0, 0, 1, 1], [], []>} : vector<16x64xf32>, vector<64x128xf32>, vector<16x128xf32> -> vector<16x128xf32>
    %205 = arith.addf %200, %204 : vector<16x128xf32>
    %206 = tpu.concatenate %81, %83, %93, %95 in 0 : vector<4x64xf32>, vector<4x64xf32>, vector<4x64xf32>, vector<4x64xf32> -> vector<16x64xf32>
    %c21 = arith.constant 21 : index
    %c0_194 = arith.constant 0 : index
    %c0_195 = arith.constant 0 : index
    %207 = vector.load %arg4[%c21, %c0_194, %c0_195] : memref<25x64x128xf32, #tpu.memory_space<vmem>>, vector<1x64x128xf32>
    %208 = vector.shape_cast %207 : vector<1x64x128xf32> to vector<64x128xf32>
    %cst_196 = arith.constant dense<0.000000e+00> : vector<16x128xf32>
    %209 = tpu.matmul %206, %208, %cst_196 {dimension_numbers = #tpu.dot_dimension_numbers<[1], [0], [0], [1], [0, 0, 1, 1], [], []>} : vector<16x64xf32>, vector<64x128xf32>, vector<16x128xf32> -> vector<16x128xf32>
    %210 = arith.addf %205, %209 : vector<16x128xf32>
    %211 = tpu.concatenate %83, %85, %95, %97 in 0 : vector<4x64xf32>, vector<4x64xf32>, vector<4x64xf32>, vector<4x64xf32> -> vector<16x64xf32>
    %c22 = arith.constant 22 : index
    %c0_197 = arith.constant 0 : index
    %c0_198 = arith.constant 0 : index
    %212 = vector.load %arg4[%c22, %c0_197, %c0_198] : memref<25x64x128xf32, #tpu.memory_space<vmem>>, vector<1x64x128xf32>
    %213 = vector.shape_cast %212 : vector<1x64x128xf32> to vector<64x128xf32>
    %cst_199 = arith.constant dense<0.000000e+00> : vector<16x128xf32>
    %214 = tpu.matmul %211, %213, %cst_199 {dimension_numbers = #tpu.dot_dimension_numbers<[1], [0], [0], [1], [0, 0, 1, 1], [], []>} : vector<16x64xf32>, vector<64x128xf32>, vector<16x128xf32> -> vector<16x128xf32>
    %215 = arith.addf %210, %214 : vector<16x128xf32>
    %216 = tpu.concatenate %85, %87, %97, %99 in 0 : vector<4x64xf32>, vector<4x64xf32>, vector<4x64xf32>, vector<4x64xf32> -> vector<16x64xf32>
    %c23 = arith.constant 23 : index
    %c0_200 = arith.constant 0 : index
    %c0_201 = arith.constant 0 : index
    %217 = vector.load %arg4[%c23, %c0_200, %c0_201] : memref<25x64x128xf32, #tpu.memory_space<vmem>>, vector<1x64x128xf32>
    %218 = vector.shape_cast %217 : vector<1x64x128xf32> to vector<64x128xf32>
    %cst_202 = arith.constant dense<0.000000e+00> : vector<16x128xf32>
    %219 = tpu.matmul %216, %218, %cst_202 {dimension_numbers = #tpu.dot_dimension_numbers<[1], [0], [0], [1], [0, 0, 1, 1], [], []>} : vector<16x64xf32>, vector<64x128xf32>, vector<16x128xf32> -> vector<16x128xf32>
    %220 = arith.addf %215, %219 : vector<16x128xf32>
    %221 = tpu.concatenate %87, %89, %99, %101 in 0 : vector<4x64xf32>, vector<4x64xf32>, vector<4x64xf32>, vector<4x64xf32> -> vector<16x64xf32>
    %c24 = arith.constant 24 : index
    %c0_203 = arith.constant 0 : index
    %c0_204 = arith.constant 0 : index
    %222 = vector.load %arg4[%c24, %c0_203, %c0_204] : memref<25x64x128xf32, #tpu.memory_space<vmem>>, vector<1x64x128xf32>
    %223 = vector.shape_cast %222 : vector<1x64x128xf32> to vector<64x128xf32>
    %cst_205 = arith.constant dense<0.000000e+00> : vector<16x128xf32>
    %224 = tpu.matmul %221, %223, %cst_205 {dimension_numbers = #tpu.dot_dimension_numbers<[1], [0], [0], [1], [0, 0, 1, 1], [], []>} : vector<16x64xf32>, vector<64x128xf32>, vector<16x128xf32> -> vector<16x128xf32>
    %225 = arith.addf %220, %224 : vector<16x128xf32>
    %226 = vector.extract_strided_slice %225 {offsets = [0, 0], sizes = [4, 128], strides = [1, 1]} : vector<16x128xf32> to vector<4x128xf32>
    %227 = vector.extract_strided_slice %225 {offsets = [4, 0], sizes = [4, 128], strides = [1, 1]} : vector<16x128xf32> to vector<4x128xf32>
    %228 = arith.maximumf %226, %227 : vector<4x128xf32>
    %229 = vector.extract_strided_slice %225 {offsets = [8, 0], sizes = [4, 128], strides = [1, 1]} : vector<16x128xf32> to vector<4x128xf32>
    %230 = vector.extract_strided_slice %225 {offsets = [12, 0], sizes = [4, 128], strides = [1, 1]} : vector<16x128xf32> to vector<4x128xf32>
    %231 = arith.maximumf %229, %230 : vector<4x128xf32>
    %232 = arith.maximumf %228, %231 : vector<4x128xf32>
    %c0_206 = arith.constant 0 : index
    %c0_207 = arith.constant 0 : index
    %233 = vector.load %arg5[%c0_206, %c0_207] : memref<1x128xf32, #tpu.memory_space<vmem>>, vector<1x128xf32>
    %234 = vector.broadcast %233 : vector<1x128xf32> to vector<4x128xf32>
    %235 = arith.addf %232, %234 : vector<4x128xf32>
    %cst_208 = arith.constant 0.000000e+00 : f32
    %236 = vector.broadcast %cst_208 : f32 to vector<4x128xf32>
    %237 = arith.maximumf %235, %236 : vector<4x128xf32>
    %238 = vector.shape_cast %237 : vector<4x128xf32> to vector<1x4x128xf32>
    %239 = vector.extract_strided_slice %238 {offsets = [0, 0, 0], sizes = [1, 1, 128], strides = [1, 1, 1]} : vector<1x4x128xf32> to vector<1x1x128xf32>
    %240 = vector.shape_cast %239 : vector<1x1x128xf32> to vector<1x128xf32>
    %241 = vector.extract_strided_slice %238 {offsets = [0, 1, 0], sizes = [1, 1, 128], strides = [1, 1, 1]} : vector<1x4x128xf32> to vector<1x1x128xf32>
    %242 = vector.shape_cast %241 : vector<1x1x128xf32> to vector<1x128xf32>
    %243 = vector.extract_strided_slice %238 {offsets = [0, 2, 0], sizes = [1, 1, 128], strides = [1, 1, 1]} : vector<1x4x128xf32> to vector<1x1x128xf32>
    %244 = vector.shape_cast %243 : vector<1x1x128xf32> to vector<1x128xf32>
    %245 = vector.extract_strided_slice %238 {offsets = [0, 3, 0], sizes = [1, 1, 128], strides = [1, 1, 1]} : vector<1x4x128xf32> to vector<1x1x128xf32>
    %246 = vector.shape_cast %245 : vector<1x1x128xf32> to vector<1x128xf32>
    %247 = tpu.concatenate %240, %242, %244, %246 in 1 : vector<1x128xf32>, vector<1x128xf32>, vector<1x128xf32>, vector<1x128xf32> -> vector<1x512xf32>
    %c0_209 = arith.constant 0 : index
    %c0_210 = arith.constant 0 : index
    %248 = vector.load %arg7[%c0_209, %c0_210] : memref<1x10xf32, #tpu.memory_space<vmem>>, vector<1x10xf32>
    %c0_211 = arith.constant 0 : index
    %c0_212 = arith.constant 0 : index
    %249 = vector.load %arg6[%c0_211, %c0_212] : memref<512x10xf32, #tpu.memory_space<vmem>>, vector<512x10xf32>
    %cst_213 = arith.constant dense<0.000000e+00> : vector<1x10xf32>
    %250 = tpu.matmul %247, %249, %cst_213 {dimension_numbers = #tpu.dot_dimension_numbers<[1], [0], [0], [1], [0, 0, 1, 1], [], []>} : vector<1x512xf32>, vector<512x10xf32>, vector<1x10xf32> -> vector<1x10xf32>
    %251 = arith.addf %248, %250 : vector<1x10xf32>
    %c0_214 = arith.constant 0 : index
    %c0_215 = arith.constant 0 : index
    %c0_216 = arith.constant 0 : index
    %252 = vector.load %arg8[%c0_214, %c0_215, %c0_216] : memref<1x1x10xf32, #tpu.memory_space<vmem>>, vector<1x1x10xf32>
    %253 = vector.shape_cast %252 : vector<1x1x10xf32> to vector<1x10xf32>
    %254 = vector.shape_cast %251 : vector<1x10xf32> to vector<1x1x10xf32>
    tpu.vector_store %arg8[%c0_214, %c0_215, %c0_216], %254 {strides = array<i32>} : memref<1x1x10xf32, #tpu.memory_space<vmem>>, vector<1x1x10xf32>,
    return
  }
  func.func @transform_0(%arg0: i32) -> (i32, i32, i32) {
    %c0_i32 = arith.constant 0 : i32
    %c0_i32_0 = arith.constant 0 : i32
    %c0_i32_1 = arith.constant 0 : i32
    return %arg0, %c0_i32, %c0_i32_0 : i32, i32, i32
  }
  func.func @transform_1(%arg0: i32) -> (i32, i32) {
    %c0_i32 = arith.constant 0 : i32
    %c0_i32_0 = arith.constant 0 : i32
    %c0_i32_1 = arith.constant 0 : i32
    return %c0_i32, %c0_i32_0 : i32, i32
  }
  func.func @transform_2(%arg0: i32) -> (i32, i32) {
    %c0_i32 = arith.constant 0 : i32
    %c0_i32_0 = arith.constant 0 : i32
    %c0_i32_1 = arith.constant 0 : i32
    return %c0_i32, %c0_i32_0 : i32, i32
  }
  func.func @transform_3(%arg0: i32) -> (i32, i32, i32) {
    %c0_i32 = arith.constant 0 : i32
    %c0_i32_0 = arith.constant 0 : i32
    %c0_i32_1 = arith.constant 0 : i32
    %c0_i32_2 = arith.constant 0 : i32
    return %c0_i32, %c0_i32_0, %c0_i32_1 : i32, i32, i32
  }
  func.func @transform_4(%arg0: i32) -> (i32, i32) {
    %c0_i32 = arith.constant 0 : i32
    %c0_i32_0 = arith.constant 0 : i32
    %c0_i32_1 = arith.constant 0 : i32
    return %c0_i32, %c0_i32_0 : i32, i32
  }
  func.func @transform_5(%arg0: i32) -> (i32, i32) {
    %c0_i32 = arith.constant 0 : i32
    %c0_i32_0 = arith.constant 0 : i32
    %c0_i32_1 = arith.constant 0 : i32
    return %c0_i32, %c0_i32_0 : i32, i32
  }
  func.func @transform_6(%arg0: i32) -> (i32, i32) {
    %c0_i32 = arith.constant 0 : i32
    %c0_i32_0 = arith.constant 0 : i32
    %c0_i32_1 = arith.constant 0 : i32
    return %c0_i32, %c0_i32_0 : i32, i32
  }
  func.func @transform_7(%arg0: i32) -> (i32, i32, i32) {
    %c0_i32 = arith.constant 0 : i32
    %c0_i32_0 = arith.constant 0 : i32
    %c0_i32_1 = arith.constant 0 : i32
    return %arg0, %c0_i32, %c0_i32_0 : i32, i32, i32
  }
}

</mosaic_0001>

<bundles_post_ra>
// kernel: cnn_forward.1
= control target key start
LH: loop header
LB: loop body
LE: loop exit
PB: predicated region body
PF: predicated region fallthrough
CT: control target
= control target key end

     0   :  { %12 = vsyncpa [#allocation4], 0  ;;  %s6080_s0 = inlined_call_operand.vmem [shape: f32[2,64,100], index: 0, kind: input, shape index: {}]   ;;  %s6081_s1 = inlined_call_operand.vmem [shape: f32[100,64], index: 1, kind: input, shape index: {}]   ;;  %s6082_s2 = inlined_call_operand.vmem [shape: f32[1,64], index: 2, kind: input, shape index: {}]   ;;  %s6083_s3 = inlined_call_operand.vmem [shape: f32[25,64,128], index: 3, kind: input, shape index: {}]   ;;  %s6084_s4 = inlined_call_operand.vmem [shape: f32[1,128], index: 4, kind: input, shape index: {}]   ;;  %s6085_s5 = inlined_call_operand.vmem [shape: f32[512,10], index: 5, kind: input, shape index: {}]   ;;  %s6086_s6 = inlined_call_operand.vmem [shape: f32[1,10], index: 6, kind: input, shape index: {}]   ;;  %s6087_s7 = inlined_call_operand.hbm [shape: f32[2,1,10], index: 7, kind: output, shape index: {}]  }
   0x1   :  { %14 = vsyncpa [#allocation4 + $0x1], 0  ;;  %s4902_s24 = smov 0   ;;  %s4904_s25 = smov 0  }
   0x2   :  { %s4906_s26 = smov 0   ;;  %s4908_s27 = smov 0  }
   0x3 LB: > { %s4923_s28 = sadd.s32 4294967295, %s4855_s27   ;;  %s3097_s29 = sadd.s32 4294967294, %s4855_s27   ;;  %s4855_s27 = sphi %s4908_s27, %s6093_s27   ;;  %s4851_s26 = sphi %s4906_s26, %s6092_s26   ;;  %s4847_s25 = sphi %s4904_s25, %s6091_s25   ;;  %s4843_s24 = sphi %s4902_s24, %s6090_s24  }
   0x4   : > { %s4927_s30 = sadd.s32 1, %s4855_s27   ;;  %s179_s8 = sadd.s32 1, %s4851_s26 }
   0x5   : > { %s176_s9 = ssub.s32 %s4855_s27, %s4927_s30  ;;  %p189_p0 = scmp.ne.s32.totalorder %s4851_s26, %s4847_s25 }
   0x6   : > { %p177_p1 = scmp.eq.s32.totalorder %s176_s9, 0  ;;  %p190_p2 = scmp.eq.s32.totalorder %s4923_s28, 1 }
   0x7   : > { %p195_p3 = scmp.ne.s32.totalorder %s4847_s25, %s4843_s24  ;;  %p196_p4 = scmp.eq.s32.totalorder %s3097_s29, 1 }
   0x8   : > { %s4938_s10 = scalar_select %p177_p1, %s4851_s26, %s179_s8  }
   0x9   : > { %p4940_p5 = por %p190_p2, %p189_p0  ;;  %p4944_p6 = por %p196_p4, %p195_p3 }
   0xa   : > { %p3100_p7 = scmp.ge.s32.totalorder %s4855_s27, 1  ;;  %p240_p8 = scmp.lt.s32.totalorder %s4855_s27, 3 }
   0xc   : > { %p241_p9 = pnand %p3100_p7, %p240_p8 }
   0xd   : > { %v284_v0 = vld [vmem:[%s6081_s1] sm:$0xff] (!%p241_p9)  ;;  %v285_v1 = vld [vmem:[%s6081_s1 + $0x8] sm:$0xff] (!%p241_p9)  ;;  %v286_v2 = vld [vmem:[%s6081_s1 + $0x10] sm:$0xff] (!%p241_p9)  ;;  %p271_p10 = scmp.lt.s32.totalorder (!%p241_p9), %s4923_s28, 1  ;;  %vm297_vm0 = vcmask (!%p241_p9), 818176   ;;  %vm322_vm1 = vcmask (!%p241_p9), 1043456  }
   0xe   : > { %244 = sbr.rel (%p241_p9) target bundleno = 1393 (0x571), region = 48  ;;  %v4214_v3 = vpack.c.bf16 (!%p241_p9), %v285_v1, %v284_v0  ;;  %v287_v4 = vld [vmem:[%s6081_s1 + $0x18] sm:$0xff] (!%p241_p9)  ;;  %v288_v6 = vld [vmem:[%s6081_s1 + $0x20] sm:$0xff] (!%p241_p9)  ;;  %v289_v7 = vld [vmem:[%s6081_s1 + $0x28] sm:$0xff] (!%p241_p9)  ;;  %vm448_vm2 = vcmask (!%p241_p9), 783360   ;;  %v4857_v30 = vmov (!%p241_p9), 0.0  }
   0xf   : > { %v4218_v5 = vpack.c.bf16 (!%p241_p9), %v287_v4, %v286_v2  ;;  %v4222_v8 = vpack.c.bf16 (!%p241_p9), %v289_v7, %v288_v6  ;;  %v290_v9 = vld [vmem:[%s6081_s1 + $0x30] sm:$0xff] (!%p241_p9)  ;;  %v291_v10 = vld [vmem:[%s6081_s1 + $0x38] sm:$0xff] (!%p241_p9)  ;;  %v292_v13 = vld [vmem:[%s6081_s1 + $0x40] sm:$0xff] (!%p241_p9)  ;;  %449 = vst.msk [vmem:[#allocation2] sm:$0x3f] (!%p241_p9), %vm448_vm2, %v4857_v30  ;;  %vm457_vm3 = vcmask (!%p241_p9), 650368  }
  0x10   : > { %4215 = vmatprep.subr.bf16.mxu0 (!%p241_p9), %v4214_v3  ;;  %v4226_v12 = vpack.c.bf16 (!%p241_p9), %v291_v10, %v290_v9  ;;  %v293_v14 = vld [vmem:[%s6081_s1 + $0x48] sm:$0xff] (!%p241_p9)  ;;  %v294_v16 = vld [vmem:[%s6081_s1 + $0x50] sm:$0xff] (!%p241_p9)  ;;  %v295_v17 = vld [vmem:[%s6081_s1 + $0x58] sm:$0xff] (!%p241_p9)  ;;  %450 = vst.msk [vmem:[#allocation2 + $0x8] sm:$0x3f] (!%p241_p9), %vm448_vm2, %v4857_v30  ;;  %vm460_vm4 = vcmask (!%p241_p9), 654468  }
  0x11   : > { %4217 = vmatpush3.bf16.msra.mxu0 (!%p241_p9), %v4214_v3  ;;  %v4230_v15 = vpack.c.bf16 (!%p241_p9), %v293_v14, %v292_v13  ;;  %v4234_v18 = vpack.c.bf16 (!%p241_p9), %v295_v17, %v294_v16  ;;  %v296_v19 = vld [vmem:[%s6081_s1 + $0x60] sm:$0xf] (!%p241_p9)  ;;  %v3206_v28 = vld [vmem:[%s6083_s3 + $0x288] sm:$0xff] (!%p241_p9)  ;;  %451 = vst.msk [vmem:[#allocation2 + $0x10] sm:$0x3f] (!%p241_p9), %vm448_vm2, %v4857_v30  ;;  %v3207_v39 = vld [vmem:[%s6083_s3 + $0x290] sm:$0xff] (!%p241_p9) }
  0x12   : > { %4219 = vmatprep.subr.bf16.mxu0 (!%p241_p9), %v4218_v5  ;;  %v3205_v27 = vld [vmem:[%s6083_s3 + $0x280] sm:$0xff] (!%p241_p9)  ;;  %452 = vst.msk [vmem:[#allocation2 + $0x18] sm:$0x3f] (!%p241_p9), %vm448_vm2, %v4857_v30  ;;  %v3208_v40 = vld [vmem:[%s6083_s3 + $0x298] sm:$0xff] (!%p241_p9)  ;;  %v3210_v46 = vld [vmem:[%s6083_s3 + $0x2a8] sm:$0xff] (!%p241_p9)  ;;  %vm519_vm5 = vcmask (!%p241_p9), 523264  }
  0x13   : > { %v4398_v29 = vpack.c.bf16 (!%p241_p9), %v3206_v28, %v3205_v27  ;;  %v4402_v41 = vpack.c.bf16 (!%p241_p9), %v3208_v40, %v3207_v39  ;;  %v3209_v45 = vld [vmem:[%s6083_s3 + $0x2a0] sm:$0xff] (!%p241_p9)  ;;  %v3211_v52 = vld [vmem:[%s6083_s3 + $0x2b0] sm:$0xff] (!%p241_p9)  ;;  %v3212_v53 = vld [vmem:[%s6083_s3 + $0x2b8] sm:$0xff] (!%p241_p9)  ;;  %s4860_s13 = smov (!%p241_p9), 96   ;;  %s269_s17 = sand.u32 (!%p241_p9), 1, %s4847_s25   ;;  %vm3027_vm6 = vcmask (!%p241_p9), 73728  }
  0x14   : > { %v4406_v48 = vpack.c.bf16 (!%p241_p9), %v3210_v46, %v3209_v45  ;;  %v3112_v50 = vld [vmem:[%s6082_s2] ss:$0 sm:$0xff] (!%p241_p9)  ;;  %v4410_v55 = vpack.c.bf16 (!%p241_p9), %v3212_v53, %v3211_v52  ;;  %v3216_v60 = vld [vmem:[%s6083_s3 + $0x2c8] sm:$0xff] (!%p241_p9)  ;;  %v3218_v6 = vld [vmem:[%s6083_s3 + $0x2d8] sm:$0xff] (!%p241_p9)  ;;  %s3356_s20 = sshll.u32 (!%p241_p9), %s4923_s28, 4  ;;  %s3030_s23 = scalar_lea.sflag (!%p241_p9), [#allocation4], %s269_s17 }
  0x15   : > { %s272_s8 = scalar_select %p271_p10, %s4923_s28, 1  ;;  %4221 = vmatpush3.bf16.msra.mxu0 %v4218_v5  ;;  %4399 = vmatprep.subr.bf16.mxu1 %v4398_v29  ;;  %v3215_v59 = vld [vmem:[%s6083_s3 + $0x2c0] sm:$0xff]  ;;  %v3217_v5 = vld [vmem:[%s6083_s3 + $0x2d0] sm:$0xff]  ;;  %v3220_v14 = vld [vmem:[%s6083_s3 + $0x2e8] sm:$0xff] }
  0x16   : > { %4223 = vmatprep.subr.bf16.mxu0 %v4222_v8  ;;  %4401 = vmatpush3.bf16.msra.mxu1 %v4398_v29  ;;  %v4414_v61 = vpack.c.bf16 %v3216_v60, %v3215_v59  ;;  %v3219_v13 = vld [vmem:[%s6083_s3 + $0x2e0] sm:$0xff]  ;;  %v3221_v16 = vld [vmem:[%s6083_s3 + $0x2f0] sm:$0xff]  ;;  %v3222_v17 = vld [vmem:[%s6083_s3 + $0x2f8] sm:$0xff]  ;;  %s6038_s22 = scalar_lea.hbm %s6087_s7, %s3356_s20  ;;  %s4861_s28 = smov [#allocation3]  }
  0x17   : > { %s3359_s9 = sshll.u32 %s272_s8, 6  ;;  %4403 = vmatprep.subr.bf16.mxu1 %v4402_v41  ;;  %s4859_s8 = smov 112   ;;  %v3117_v28 = vld [vmem:[%s6083_s3 + $0x60] sm:$0xff]  ;;  %v3118_v29 = vld [vmem:[%s6083_s3 + $0x68] sm:$0xff]  ;;  %v3228_v39 = vld [vmem:[%s6083_s3 + $0x318] sm:$0xff] }
  0x18   : > { %s4973_s15 = scalar_lea.vmem %s6080_s0, %s3359_s9  ;;  %v4246_v30 = vpack.c.bf16 %v3118_v29, %v3117_v28  ;;  %v3229_v45 = vld [vmem:[%s6083_s3 + $0x320] sm:$0xff]  ;;  %v3230_v46 = vld [vmem:[%s6083_s3 + $0x328] sm:$0xff]  ;;  %v3231_v53 = vld [vmem:[%s6083_s3 + $0x330] sm:$0xff]  ;;  %s4797_s9 = sshll.u32 %s4861_s28, 4  ;;  %s4798_s9 = int_to_ptr.vmem [resolvable:$false] %s4797_s9 }
  0x19   : > { %v276_v11 = vld [vmem:[%s4973_s15] sm:$0xff]  ;;  %4225 = vmatpush3.bf16.msra.mxu0 %v4222_v8  ;;  %v277_v20 = vld [vmem:[%s4973_s15 + $0x8] sm:$0xff]  ;;  %v278_v21 = vld [vmem:[%s4973_s15 + $0x10] sm:$0xff]  ;;  %s4799_s14 = scalar_lea.vmem %s4798_s9, 32 }
  0x1a   : > { %3727 = vmatprep.mubr.msk.f32.mxu0 %vm297_vm0, %v276_v11  ;;  %4227 = vmatprep.subr.bf16.mxu0 %v4226_v12  ;;  %v279_v22 = vld [vmem:[%s4973_s15 + $0x18] sm:$0xff]  ;;  %v280_v23 = vld [vmem:[%s4973_s15 + $0x20] sm:$0xff]  ;;  %v281_v24 = vld [vmem:[%s4973_s15 + $0x28] sm:$0xff]  ;;  %v4418_v11 = vpack.c.bf16 %v3218_v6, %v3217_v5 }
  0x1b   : > { %v282_v25 = vld [vmem:[%s4973_s15 + $0x30] sm:$0xff]  ;;  %v283_v26 = vld [vmem:[%s4973_s15 + $0x38] sm:$0xff]  ;;  %4405 = vmatpush3.bf16.msra.mxu1 %v4402_v41  ;;  %s4858_s15 = smov 16  }
  0x1c   : > { %4407 = vmatprep.subr.bf16.mxu1 %v4406_v48  ;;  %v3237_v5 = vld [vmem:[%s6083_s3 + $0x350] sm:$0xff]  ;;  %v3238_v6 = vld [vmem:[%s6083_s3 + $0x358] sm:$0xff] }
  0x1d   : > { %4229 = vmatpush3.bf16.msra.mxu0 %v4226_v12 }
  0x1e   : > { %4231 = vmatprep.subr.bf16.mxu0 %v4230_v15 }
  0x1f   : > { %4409 = vmatpush3.bf16.msra.mxu1 %v4406_v48 }
  0x20   : > { %4411 = vmatprep.subr.bf16.mxu1 %v4410_v55 }
  0x21   : > { %4233 = vmatpush3.bf16.msra.mxu0 %v4230_v15  ;;  %v4422_v15 = vpack.c.bf16 %v3220_v14, %v3219_v13  ;;  %v3241_v14 = vld [vmem:[%s6083_s3 + $0x370] sm:$0xff] }
  0x22   : > { %4235 = vmatprep.subr.bf16.mxu0 %v4234_v18 }
  0x23   : > { %4413 = vmatpush3.bf16.msra.mxu1 %v4410_v55 }
  0x24   : > { %4415 = vmatprep.subr.bf16.mxu1 %v4414_v61 }
  0x25   : > { %4237 = vmatpush3.bf16.msra.mxu0 %v4234_v18  ;;  %v4426_v18 = vpack.c.bf16 %v3222_v17, %v3221_v16  ;;  %v3245_v17 = vld [vmem:[%s6083_s3 + $0x380] sm:$0xff] }
  0x26   : > { %3725 = vmatprep.subr.msk.mxu0 %vm322_vm1, %v296_v19 }
  0x29   : > { %3726 = vmatpush3.msk.msra.mxu0 %vm322_vm1, %v296_v19  ;;  %v3225_v19 = vld [vmem:[%s6083_s3 + $0x300] sm:$0xff] }
  0x2a   : > { %3728 = vmatmul.mubr.msk.f32.vlgmr.msra.gmra.mrb[0].mxu0 %vm297_vm0, %v277_v20  ;;  %v3226_v20 = vld [vmem:[%s6083_s3 + $0x308] sm:$0xff] }
  0x2b   : > { %3730 = vmatprep.mubr.msk.f32.mxu0 %vm297_vm0, %v278_v21  ;;  %v4430_v21 = vpack.c.bf16 %v3226_v20, %v3225_v19 }
  0x2e   : > { %3731 = vmatmul.mubr.msk.f32.gmra.mrb[2].mxu0 %vm297_vm0, %v279_v22  ;;  %v3113_v22 = vld [vmem:[%s6083_s3 + $0x40] sm:$0xff] }
  0x2f   : > { %3733 = vmatprep.mubr.msk.f32.mxu0 %vm297_vm0, %v280_v23  ;;  %v3114_v23 = vld [vmem:[%s6083_s3 + $0x48] sm:$0xff] }
  0x32   : > { %3734 = vmatmul.mubr.msk.f32.gmra.mrb[4].mxu0 %vm297_vm0, %v281_v24  ;;  %v4238_v24 = vpack.c.bf16 %v3114_v23, %v3113_v22  ;;  %v3248_v22 = vld [vmem:[%s6083_s3 + $0x398] sm:$0xff] }
  0x33   : > { %3736 = vmatprep.mubr.msk.f32.mxu0 %vm297_vm0, %v282_v25  ;;  %v3115_v25 = vld [vmem:[%s6083_s3 + $0x50] sm:$0xff] }
  0x34   : > { %4239 = vmatprep.subr.bf16.mxu0 %v4238_v24 }
  0x35   : > { %4241 = vmatpush3.bf16.msra.mxu0 %v4238_v24 }
  0x36   : > { %3737 = vmatmul.mubr.msk.f32.gmra.mrb[6].mxu0 %vm297_vm0, %v283_v26  ;;  %v3116_v26 = vld [vmem:[%s6083_s3 + $0x58] sm:$0xff] }
  0x37   : > { %v4242_v27 = vpack.c.bf16 %v3116_v26, %v3115_v25  ;;  %v3249_v26 = vld [vmem:[%s6083_s3 + $0x3a0] sm:$0xff] }
  0x39   : > { %4243 = vmatprep.subr.bf16.mxu0 %v4242_v27 }
  0x3a   : > { %4245 = vmatpush3.bf16.msra.mxu0 %v4242_v27  ;;  %v3250_v27 = vld [vmem:[%s6083_s3 + $0x3a8] sm:$0xff] }
  0x3b   : > { %4247 = vmatprep.subr.bf16.mxu0 %v4246_v30  ;;  %v4470_v28 = vpack.c.bf16 %v3250_v27, %v3249_v26  ;;  %v3131_v26 = vld [vmem:[%s6083_s3 + $0xb0] sm:$0xff]  ;;  %v3132_v27 = vld [vmem:[%s6083_s3 + $0xb8] sm:$0xff] }
  0x3e   : > { %4249 = vmatpush3.bf16.msra.mxu0 %v4246_v30 }
  0xfd   : > { %v3729_v31 = vpop.f32.mrb[0].mxu0 }
  0xfe   : > { %v392_v32 = vpop.f32.mrb[1].mxu0 }
 0x101   : > { %v3732_v33 = vpop.f32.mrb[2].mxu0 }
 0x102   : > { %v432_v34 = vmax.f32 %v3729_v31, %v3732_v33  ;;  %v402_v35 = vpop.f32.mrb[3].mxu0  ;;  %v3119_v31 = vld [vmem:[%s6083_s3 + $0x70] sm:$0xff] }
 0x103   : > { %v431_v36 = vmax.f32 %v392_v32, %v402_v35  ;;  %v3120_v32 = vld [vmem:[%s6083_s3 + $0x78] sm:$0xff]  ;;  %v490_v35 = vld [vmem:[%s6083_s3] sm:$0xff] }
 0x104   : > { %v4250_v33 = vpack.c.bf16 %v3120_v32, %v3119_v31  ;;  %v3251_v32 = vld [vmem:[%s6083_s3 + $0x3b0] sm:$0xff] }
 0x105   : > { %v3735_v37 = vpop.f32.mrb[4].mxu0 }
 0x106   : > { %v412_v38 = vpop.f32.mrb[5].mxu0  ;;  %4251 = vmatprep.subr.bf16.mxu0 %v4250_v33 }
 0x107   : > { %4253 = vmatpush3.bf16.msra.mxu0 %v4250_v33  ;;  %v3252_v33 = vld [vmem:[%s6083_s3 + $0x3b8] sm:$0xff] }
 0x109   : > { %v3738_v42 = vpop.f32.mrb[6].mxu0 }
 0x10a   : > { %v434_v43 = vmax.f32 %v3735_v37, %v3738_v42  ;;  %v422_v44 = vpop.f32.mrb[7].mxu0  ;;  %v491_v37 = vld [vmem:[%s6083_s3 + $0x8] sm:$0xff] }
 0x10b   : > { %v433_v47 = vmax.f32 %v412_v38, %v422_v44  ;;  %v3227_v38 = vld [vmem:[%s6083_s3 + $0x310] sm:$0xff]  ;;  %v5130_v40 = vpack.c.bf16 %v491_v37, %v490_v35  ;;  %v493_v35 = vld [vmem:[%s6083_s3 + $0x18] sm:$0xff] }
 0x10c   : > { %v436_v49 = vmax.f32 %v432_v34, %v434_v43  ;;  %v4434_v43 = vpack.c.bf16 %v3228_v39, %v3227_v38  ;;  %v3255_v39 = vld [vmem:[%s6083_s3 + $0x3c0] sm:$0xff] }
 0x10d   : > { %v435_v51 = vmax.f32 %v431_v36, %v433_v47  ;;  %4255 = vmatprep.subr.bf16.mxu0 %v5130_v40 }
 0x10e   : > { %v445_v56 = vadd.f32 %v3112_v50, %v436_v49  ;;  %v4438_v49 = vpack.c.bf16 %v3230_v46, %v3229_v45  ;;  %v4474_v45 = vpack.c.bf16 %v3252_v33, %v3251_v32  ;;  %v4282_v32 = vpack.c.bf16 %v3132_v27, %v3131_v26  ;;  %v3135_v33 = vld [vmem:[%s6083_s3 + $0xc0] sm:$0xff] }
 0x10f   : > { %v444_v54 = vadd.f32 %v3112_v50, %v435_v51  ;;  %v3295_v26 = vld [vmem:[%s6083_s3 + $0x4c0] sm:$0xff] }
 0x110   : > { %v447_v58 = vmax.f32 %v445_v56, 0.0 }
 0x111   : > { %v446_v57 = vmax.f32 %v444_v54, 0.0  ;;  %v3232_v54 = vld [vmem:[%s6083_s3 + $0x338] sm:$0xff] }
 0x113   : > { %454 = vrot.lane.b32.xlu0 %v446_v57, %s4858_s15 }
 0x117   : > { %463 = vrot.lane.b32.xlu0 %v447_v58, %s4858_s15  ;;  %v4442_v58 = vpack.c.bf16 %v3232_v54, %v3231_v53  ;;  %v3258_v53 = vld [vmem:[%s6083_s3 + $0x3d8] sm:$0xff] }
 0x185   : > { %v455_v62 = vpop.permute.xlu0 %454 }
 0x186   : > { %458 = vst.msk [vmem:[#allocation2 + $0x1] sm:$0xf] %vm457_vm3, %v455_v62 }
 0x187   : > { %461 = vst.msk [vmem:[#allocation2 + $0x5] sm:$0xf0] %vm460_vm4, %v455_v62  ;;  %v3235_v62 = vld [vmem:[%s6083_s3 + $0x340] sm:$0xff] }
 0x189   : > { %v464_v63 = vpop.permute.xlu0 %463 }
 0x18a   : > { %467 = vst.msk [vmem:[#allocation2 + $0x11] sm:$0xf] %vm457_vm3, %v464_v63 }
 0x18b   : > { %469 = vst.msk [vmem:[#allocation2 + $0x15] sm:$0xf0] %vm460_vm4, %v464_v63  ;;  %v3236_v63 = vld [vmem:[%s6083_s3 + $0x348] sm:$0xff] }
 0x18d   : > { %v474_v0 = vld [vmem:[#allocation2 + $0x1] sm:$0xf] }
 0x18e   : > { %v475_v1 = vld [vmem:[#allocation2 + $0x9] sm:$0xf]  ;;  %v1058_v2 = vrot.slane %v474_v0, 4  ;;  %v470_v44 = vld [vmem:[#allocation2] sm:$0xf] }
 0x18f   : > { %v965_v3 = vrot.slane %v475_v1, 4  ;;  %v499_v48 = vrot.slane %v470_v44, 4  ;;  %v478_v50 = vld [vmem:[#allocation2 + $0x2] sm:$0xf]  ;;  %v5152_v52 = vld [vmem:[#allocation2 + $0x8] sm:$0xf] }
 0x190   : > { %1059 = vrot.lane.b32.xlu1 %v1058_v2, %s4859_s8  ;;  %v1974_v56 = vrot.slane %v478_v50, 4  ;;  %v483_v59 = vrot.slane %v5152_v52, 4 }
 0x191   : > { %v5049_v4 = vsel %vm322_vm1, %v474_v0, %v965_v3  ;;  %v476_v7 = vld [vmem:[#allocation2 + $0x11] sm:$0xf]  ;;  %v4446_v3 = vpack.c.bf16 %v3236_v63, %v3235_v62  ;;  %v3125_v63 = vld [vmem:[%s6083_s3 + $0x80] sm:$0xff] }
 0x192   : > { %1161 = vrot.lane.b32.xlu0 %v5049_v4, %s4859_s8  ;;  %3945 = vmatprep.mubr.msk.f32.mxu1 %vm519_vm5, %v5049_v4  ;;  %v477_v8 = vld [vmem:[#allocation2 + $0x19] sm:$0xf]  ;;  %v1516_v9 = vrot.slane %v476_v7, 4  ;;  %v472_v51 = vld [vmem:[#allocation2 + $0x10] sm:$0xf]  ;;  %v5178_v0 = vsel %vm322_vm1, %v470_v44, %v483_v59  ;;  %v3260_v59 = vld [vmem:[%s6083_s3 + $0x3e8] sm:$0xff] }
 0x193   : > { %v1423_v10 = vrot.slane %v477_v8, 4  ;;  %v5163_v55 = vld [vmem:[#allocation2 + $0x18] sm:$0xf]  ;;  %v504_v57 = vrot.slane %v472_v51, 4  ;;  %v480_v54 = vld [vmem:[#allocation2 + $0x12] sm:$0xf] }
 0x194   : > { %1517 = vrot.lane.b32.xlu1 %v1516_v9, %s4859_s8  ;;  %v486_v60 = vrot.slane %v5163_v55, 4 }
 0x195   : > { %v5063_v12 = vsel %vm322_vm1, %v476_v7, %v1423_v10  ;;  %v3239_v10 = vld [vmem:[%s6083_s3 + $0x360] sm:$0xff] }
 0x196   : > { %3946 = vmatmul.mubr.msk.f32.vlgmr.msra.gmra.mrb[0].mxu1 %vm519_vm5, %v5063_v12 }
 0x197   : > { %4417 = vmatpush3.bf16.msra.mxu1 %v4414_v61  ;;  %v5169_v61 = vld [vmem:[#allocation2 + $0xa] sm:$0xf] }
 0x198   : > { %4419 = vmatprep.subr.bf16.mxu1 %v4418_v11  ;;  %1619 = vrot.lane.b32.xlu1 %v5063_v12, %s4859_s8  ;;  %v1881_v2 = vrot.slane %v5169_v61, 4 }
 0x19a   : > { %v5195_v7 = vsel %vm322_vm1, %v478_v50, %v1881_v2 }
 0x19b   : > { %4421 = vmatpush3.bf16.msra.mxu1 %v4418_v11  ;;  %v3240_v11 = vld [vmem:[%s6083_s3 + $0x368] sm:$0xff] }
 0x19c   : > { %4423 = vmatprep.subr.bf16.mxu1 %v4422_v15  ;;  %v4454_v13 = vpack.c.bf16 %v3240_v11, %v3239_v10  ;;  %v3128_v10 = vld [vmem:[%s6083_s3 + $0x98] sm:$0xff]  ;;  %v3265_v11 = vld [vmem:[%s6083_s3 + $0x400] sm:$0xff] }
 0x19f   : > { %4425 = vmatpush3.bf16.msra.mxu1 %v4422_v15  ;;  %v3242_v15 = vld [vmem:[%s6083_s3 + $0x378] sm:$0xff] }
 0x1a0   : > { %4427 = vmatprep.subr.bf16.mxu1 %v4426_v18  ;;  %v4458_v16 = vpack.c.bf16 %v3242_v15, %v3241_v14 }
 0x1a3   : > { %4429 = vmatpush3.bf16.msra.mxu1 %v4426_v18  ;;  %v3246_v18 = vld [vmem:[%s6083_s3 + $0x388] sm:$0xff] }
 0x1a4   : > { %4431 = vmatprep.subr.bf16.mxu1 %v4430_v21  ;;  %v4462_v19 = vpack.c.bf16 %v3246_v18, %v3245_v17  ;;  %v3130_v17 = vld [vmem:[%s6083_s3 + $0xa8] sm:$0xff] }
 0x202   : > { %v1060_v34 = vpop.permute.xlu1 %1059 }
 0x203   : > { %v5115_v36 = vsel %vm322_vm1, %v475_v1, %v1060_v34  ;;  %v5181_v1 = vsel %vm322_vm1, %v472_v51, %v486_v60  ;;  %v492_v34 = vld [vmem:[%s6083_s3 + $0x10] sm:$0xff]  ;;  %v2432_v60 = vrot.slane %v480_v54, 4 }
 0x204   : > { %1251 = vrot.lane.b32.xlu0 %v5115_v36, %s4859_s8  ;;  %3964 = vmatprep.mubr.msk.f32.mxu1 %vm519_vm5, %v5115_v36  ;;  %v5146_v47 = vpop.permute.xlu0 %1161  ;;  %v4258_v46 = vpack.c.bf16 %v493_v35, %v492_v34  ;;  %v3136_v34 = vld [vmem:[%s6083_s3 + $0xc8] sm:$0xff] }
 0x206   : > { %v1518_v41 = vpop.permute.xlu1 %1517 }
 0x207   : > { %v5134_v42 = vsel %vm322_vm1, %v477_v8, %v1518_v41  ;;  %v4450_v8 = vpack.c.bf16 %v3238_v6, %v3237_v5  ;;  %v3256_v41 = vld [vmem:[%s6083_s3 + $0x3c8] sm:$0xff]  ;;  %v3262_v6 = vld [vmem:[%s6083_s3 + $0x3f8] sm:$0xff] }
 0x208   : > { %1341 = vrot.lane.b32.xlu0 %v5049_v4, %s4860_s13  ;;  %1709 = vrot.lane.b32.xlu1 %v5134_v42, %s4859_s8  ;;  %v4478_v50 = vpack.c.bf16 %v3256_v41, %v3255_v39  ;;  %v3137_v39 = vld [vmem:[%s6083_s3 + $0xd0] sm:$0xff]  ;;  %v3138_v41 = vld [vmem:[%s6083_s3 + $0xd8] sm:$0xff] }
 0x209   : > { %3965 = vmatmul.mubr.msk.f32.vlgmr.msra.gmra.mrb[0].mxu1 %vm519_vm5, %v5134_v42 }
 0x20a   : > { %4433 = vmatpush3.bf16.msra.mxu1 %v4430_v21  ;;  %3983 = vmatprep.mubr.msk.f32.mxu1 %vm519_vm5, %v5146_v47  ;;  %v5197_v9 = vpop.permute.xlu1 %1619  ;;  %v3247_v21 = vld [vmem:[%s6083_s3 + $0x390] sm:$0xff] }
 0x20b   : > { %4435 = vmatprep.subr.bf16.mxu1 %v4434_v43  ;;  %v4466_v23 = vpack.c.bf16 %v3248_v22, %v3247_v21  ;;  %v3267_v21 = vld [vmem:[%s6083_s3 + $0x410] sm:$0xff]  ;;  %v3268_v22 = vld [vmem:[%s6083_s3 + $0x418] sm:$0xff] }
 0x20c   : > { %500 = vrot.lane.b32.xlu0 %v499_v48, %s4859_s8  ;;  %1799 = vrot.lane.b32.xlu1 %v5063_v12, %s4860_s13  ;;  %v494_v48 = vld [vmem:[%s6083_s3 + $0x20] sm:$0xff] }
 0x20e   : > { %4437 = vmatpush3.bf16.msra.mxu1 %v4434_v43 }
 0x20f   : > { %4439 = vmatprep.subr.bf16.mxu1 %v4438_v49 }
 0x210   : > { %1975 = vrot.lane.b32.xlu0 %v1974_v56, %s4859_s8  ;;  %505 = vrot.lane.b32.xlu1 %v504_v57, %s4859_s8  ;;  %v5308_v56 = vld [vmem:[#allocation2 + $0x1a] sm:$0xf] }
 0x211   : > { %v2339_v62 = vrot.slane %v5308_v56, 4 }
 0x212   : > { %4441 = vmatpush3.bf16.msra.mxu1 %v4438_v49  ;;  %v495_v49 = vld [vmem:[%s6083_s3 + $0x28] sm:$0xff] }
 0x213   : > { %4443 = vmatprep.subr.bf16.mxu1 %v4442_v58  ;;  %v4262_v51 = vpack.c.bf16 %v495_v49, %v494_v48  ;;  %v5334_v5 = vsel %vm322_vm1, %v480_v54, %v2339_v62  ;;  %v3276_v48 = vld [vmem:[%s6083_s3 + $0x448] sm:$0xff]  ;;  %v4290_v49 = vpack.c.bf16 %v3138_v41, %v3137_v39  ;;  %v3277_v54 = vld [vmem:[%s6083_s3 + $0x450] sm:$0xff]  ;;  %v3299_v41 = vld [vmem:[%s6083_s3 + $0x4e0] sm:$0xff] }
 0x214   : > { %691 = vrot.lane.b32.xlu1 %v5178_v0, %s4859_s8  ;;  %693 = vrot.lane.b32.xlu0 %v5181_v1, %s4859_s8 }
 0x216   : > { %4445 = vmatpush3.bf16.msra.mxu1 %v4442_v58  ;;  %v3259_v58 = vld [vmem:[%s6083_s3 + $0x3e0] sm:$0xff] }
 0x217   : > { %4447 = vmatprep.subr.bf16.mxu1 %v4446_v3  ;;  %v4486_v2 = vpack.c.bf16 %v3260_v59, %v3259_v58  ;;  %v3142_v58 = vld [vmem:[%s6083_s3 + $0xf8] sm:$0xff] }
 0x218   : > { %2077 = vrot.lane.b32.xlu1 %v5195_v7, %s4859_s8 }
 0x219   : > { %3984 = vmatmul.mubr.msk.f32.vlgmr.msra.gmra.mrb[0].mxu1 %vm519_vm5, %v5197_v9 }
 0x21a   : > { %4449 = vmatpush3.bf16.msra.mxu1 %v4446_v3  ;;  %v3261_v3 = vld [vmem:[%s6083_s3 + $0x3f0] sm:$0xff] }
 0x21b   : > { %4451 = vmatprep.subr.bf16.mxu1 %v4450_v8  ;;  %v4490_v14 = vpack.c.bf16 %v3262_v6, %v3261_v3  ;;  %v3282_v3 = vld [vmem:[%s6083_s3 + $0x478] sm:$0xff] }
 0x21e   : > { %4453 = vmatpush3.bf16.msra.mxu1 %v4450_v8  ;;  %v3127_v8 = vld [vmem:[%s6083_s3 + $0x90] sm:$0xff] }
 0x21f   : > { %4455 = vmatprep.subr.bf16.mxu1 %v4454_v13  ;;  %v4274_v15 = vpack.c.bf16 %v3128_v10, %v3127_v8  ;;  %v3285_v8 = vld [vmem:[%s6083_s3 + $0x480] sm:$0xff]  ;;  %v3286_v10 = vld [vmem:[%s6083_s3 + $0x488] sm:$0xff] }
 0x222   : > { %4457 = vmatpush3.bf16.msra.mxu1 %v4454_v13  ;;  %v3266_v13 = vld [vmem:[%s6083_s3 + $0x408] sm:$0xff] }
 0x223   : > { %4459 = vmatprep.subr.bf16.mxu1 %v4458_v16 }
 0x226   : > { %4461 = vmatpush3.bf16.msra.mxu1 %v4458_v16  ;;  %v3129_v16 = vld [vmem:[%s6083_s3 + $0xa0] sm:$0xff] }
 0x227   : > { %4463 = vmatprep.subr.bf16.mxu1 %v4462_v19 }
 0x276   : > { %v5221_v20 = vpop.permute.xlu0 %1251 }
 0x277   : > { %4002 = vmatprep.mubr.msk.f32.mxu1 %vm519_vm5, %v5221_v20 }
 0x27a   : > { %v5231_v24 = vpop.permute.xlu1 %1709  ;;  %v5233_v25 = vpop.permute.xlu0 %1341 }
 0x27b   : > { %4003 = vmatmul.mubr.msk.f32.vlgmr.msra.gmra.mrb[0].mxu1 %vm519_vm5, %v5231_v24 }
 0x27c   : > { %4465 = vmatpush3.bf16.msra.mxu1 %v4462_v19  ;;  %4021 = vmatprep.mubr.msk.f32.mxu1 %vm519_vm5, %v5233_v25  ;;  %v4494_v19 = vpack.c.bf16 %v3266_v13, %v3265_v11  ;;  %v4526_v11 = vpack.c.bf16 %v3286_v10, %v3285_v8  ;;  %v3287_v13 = vld [vmem:[%s6083_s3 + $0x490] sm:$0xff]  ;;  %v3160_v8 = vld [vmem:[%s6083_s3 + $0x168] sm:$0xff] }
 0x27d   : > { %4467 = vmatprep.subr.bf16.mxu1 %v4466_v23 }
 0x27e   : > { %v5245_v29 = vpop.permute.xlu1 %1799  ;;  %v501_v30 = vpop.permute.xlu0 %500 }
 0x27f   : > { %v508_v31 = vsel %vm322_vm1, %v5152_v52, %v501_v30  ;;  %v3257_v52 = vld [vmem:[%s6083_s3 + $0x3d0] sm:$0xff]  ;;  %v3269_v30 = vld [vmem:[%s6083_s3 + $0x420] sm:$0xff] }
 0x280   : > { %4469 = vmatpush3.bf16.msra.mxu1 %v4466_v23  ;;  %785 = vrot.lane.b32.xlu0 %v508_v31, %s4859_s8  ;;  %v4482_v57 = vpack.c.bf16 %v3258_v53, %v3257_v52  ;;  %v4278_v23 = vpack.c.bf16 %v3130_v17, %v3129_v16  ;;  %v3140_v52 = vld [vmem:[%s6083_s3 + $0xe8] sm:$0xff]  ;;  %v3289_v17 = vld [vmem:[%s6083_s3 + $0x4a0] sm:$0xff] }
 0x281   : > { %3755 = vmatprep.mubr.msk.f32.mxu0 %vm519_vm5, %v508_v31  ;;  %4471 = vmatprep.subr.bf16.mxu1 %v4470_v28  ;;  %v3270_v31 = vld [vmem:[%s6083_s3 + $0x428] sm:$0xff] }
 0x282   : > { %v506_v37 = vpop.permute.xlu1 %505  ;;  %v1976_v38 = vpop.permute.xlu0 %1975  ;;  %v4502_v35 = vpack.c.bf16 %v3270_v31, %v3269_v30  ;;  %v3147_v30 = vld [vmem:[%s6083_s3 + $0x110] sm:$0xff]  ;;  %v3148_v31 = vld [vmem:[%s6083_s3 + $0x118] sm:$0xff] }
 0x283   : > { %v5271_v43 = vsel %vm322_vm1, %v5163_v55, %v506_v37  ;;  %v5275_v44 = vsel %vm322_vm1, %v5169_v61, %v1976_v38  ;;  %v497_v55 = vld [vmem:[%s6083_s3 + $0x38] sm:$0xff]  ;;  %v3271_v37 = vld [vmem:[%s6083_s3 + $0x430] sm:$0xff] }
 0x284   : > { %4473 = vmatpush3.bf16.msra.mxu1 %v4470_v28  ;;  %787 = vrot.lane.b32.xlu1 %v5271_v43, %s4859_s8  ;;  %v4498_v28 = vpack.c.bf16 %v3268_v22, %v3267_v21  ;;  %v3272_v38 = vld [vmem:[%s6083_s3 + $0x438] sm:$0xff]  ;;  %v3291_v21 = vld [vmem:[%s6083_s3 + $0x4b0] sm:$0xff] }
 0x285   : > { %3756 = vmatmul.mubr.msk.f32.vlgmr.msra.gmra.mrb[8].mxu0 %vm519_vm5, %v5271_v43  ;;  %2167 = vrot.lane.b32.xlu0 %v5275_v44, %s4859_s8  ;;  %v3292_v22 = vld [vmem:[%s6083_s3 + $0x4b8] sm:$0xff] }
 0x286   : > { %4257 = vmatpush3.bf16.msra.mxu0 %v5130_v40  ;;  %3774 = vmatprep.mubr.msk.f32.mxu0 %vm519_vm5, %v5178_v0  ;;  %v496_v40 = vld [vmem:[%s6083_s3 + $0x30] sm:$0xff]  ;;  %v692_v18 = vpop.permute.xlu1 %691 }
 0x287   : > { %4475 = vmatprep.subr.bf16.mxu1 %v4474_v45  ;;  %4259 = vmatprep.subr.bf16.mxu0 %v4258_v46  ;;  %v4266_v61 = vpack.c.bf16 %v497_v55, %v496_v40  ;;  %v3278_v40 = vld [vmem:[%s6083_s3 + $0x458] sm:$0xff] }
 0x288   : > { %4477 = vmatpush3.bf16.msra.mxu1 %v4474_v45  ;;  %879 = vrot.lane.b32.xlu1 %v5178_v0, %s4860_s13  ;;  %v3126_v0 = vld [vmem:[%s6083_s3 + $0x88] sm:$0xff]  ;;  %v4506_v45 = vpack.c.bf16 %v3272_v38, %v3271_v37  ;;  %v4514_v59 = vpack.c.bf16 %v3278_v40, %v3277_v54  ;;  %v3149_v38 = vld [vmem:[%s6083_s3 + $0x120] sm:$0xff]  ;;  %v3302_v54 = vld [vmem:[%s6083_s3 + $0x4f8] sm:$0xff] }
 0x289   : > { %881 = vrot.lane.b32.xlu0 %v5181_v1, %s4860_s13  ;;  %4479 = vmatprep.subr.bf16.mxu1 %v4478_v50 }
 0x28a   : > { %4261 = vmatpush3.bf16.msra.mxu0 %v4258_v46  ;;  %v3275_v46 = vld [vmem:[%s6083_s3 + $0x440] sm:$0xff]  ;;  %v5466_v16 = vpop.permute.xlu1 %2077 }
 0x28b   : > { %4022 = vmatmul.mubr.msk.f32.vlgmr.msra.gmra.mrb[0].mxu1 %vm519_vm5, %v5245_v29  ;;  %4263 = vmatprep.subr.bf16.mxu0 %v4262_v51  ;;  %v4510_v53 = vpack.c.bf16 %v3276_v48, %v3275_v46 }
 0x28c   : > { %4481 = vmatpush3.bf16.msra.mxu1 %v4478_v50  ;;  %4040 = vmatprep.mubr.msk.f32.mxu1 %vm519_vm5, %v5063_v12  ;;  %v4270_v12 = vpack.c.bf16 %v3126_v0, %v3125_v63  ;;  %v5410_v50 = vpop.permute.xlu0 %693  ;;  %v3145_v63 = vld [vmem:[%s6083_s3 + $0x100] sm:$0xff]  ;;  %v3146_v0 = vld [vmem:[%s6083_s3 + $0x108] sm:$0xff] }
 0x28d   : > { %2257 = vrot.lane.b32.xlu1 %v5195_v7, %s4860_s13  ;;  %2433 = vrot.lane.b32.xlu0 %v2432_v60, %s4859_s8  ;;  %v3279_v60 = vld [vmem:[%s6083_s3 + $0x460] sm:$0xff] }
 0x28e   : > { %4265 = vmatpush3.bf16.msra.mxu0 %v4262_v51  ;;  %4483 = vmatprep.subr.bf16.mxu1 %v4482_v57  ;;  %v3139_v51 = vld [vmem:[%s6083_s3 + $0xe0] sm:$0xff] }
 0x28f   : > { %4267 = vmatprep.subr.bf16.mxu0 %v4266_v61  ;;  %v4294_v55 = vpack.c.bf16 %v3140_v52, %v3139_v51  ;;  %v3151_v51 = vld [vmem:[%s6083_s3 + $0x130] sm:$0xff] }
 0x290   : > { %4485 = vmatpush3.bf16.msra.mxu1 %v4482_v57  ;;  %v3141_v57 = vld [vmem:[%s6083_s3 + $0xf0] sm:$0xff] }
 0x291   : > { %2535 = vrot.lane.b32.xlu1 %v5334_v5, %s4859_s8  ;;  %4487 = vmatprep.subr.bf16.mxu1 %v4486_v2  ;;  %v4298_v62 = vpack.c.bf16 %v3142_v58, %v3141_v57  ;;  %v3155_v57 = vld [vmem:[%s6083_s3 + $0x140] sm:$0xff]  ;;  %v3156_v58 = vld [vmem:[%s6083_s3 + $0x148] sm:$0xff] }
 0x292   : > { %4269 = vmatpush3.bf16.msra.mxu0 %v4266_v61  ;;  %v3280_v61 = vld [vmem:[%s6083_s3 + $0x468] sm:$0xff] }
 0x293   : > { %4271 = vmatprep.subr.bf16.mxu0 %v4270_v12 }
 0x294   : > { %4489 = vmatpush3.bf16.msra.mxu1 %v4486_v2  ;;  %v4518_v2 = vpack.c.bf16 %v3280_v61, %v3279_v60  ;;  %v3305_v60 = vld [vmem:[%s6083_s3 + $0x500] sm:$0xff]  ;;  %v3306_v61 = vld [vmem:[%s6083_s3 + $0x508] sm:$0xff] }
 0x295   : > { %3775 = vmatmul.mubr.msk.f32.vlgmr.msra.gmra.mrb[8].mxu0 %vm519_vm5, %v5181_v1  ;;  %2715 = vrot.lane.b32.xlu1 %v5334_v5, %s4860_s13  ;;  %s270_s13 = scalar_lea.vmem [#allocation3], %s269_s17 }
 0x296   : > { %4273 = vmatpush3.bf16.msra.mxu0 %v4270_v12  ;;  %3793 = vmatprep.mubr.msk.f32.mxu0 %vm519_vm5, %v692_v18  ;;  %v3281_v12 = vld [vmem:[%s6083_s3 + $0x470] sm:$0xff]  ;;  %v3290_v18 = vld [vmem:[%s6083_s3 + $0x4a8] sm:$0xff]  ;;  %s3042_s15 = sshll.u32 %s270_s13, 4  ;;  %s6040_s15 = int_to_ptr.vmem [resolvable:$true] %s3042_s15 }
 0x297   : > { %4491 = vmatprep.subr.bf16.mxu1 %v4490_v14  ;;  %4275 = vmatprep.subr.bf16.mxu0 %v4274_v15  ;;  %v4522_v6 = vpack.c.bf16 %v3282_v3, %v3281_v12  ;;  %v3158_v12 = vld [vmem:[%s6083_s3 + $0x158] sm:$0xff]  ;;  %s4793_s29 = scalar_lea.vmem %s6040_s15, 16  ;;  %p4800_p0 = scmp.lt.s32.totalorder %s6040_s15, %s4798_s9 }
 0x298   : > { %4493 = vmatpush3.bf16.msra.mxu1 %v4490_v14  ;;  %v3288_v14 = vld [vmem:[%s6083_s3 + $0x498] sm:$0xff]  ;;  %p4794_p11 = scmp.ne.s32.totalorder %s6040_s15, %s4793_s29  ;;  %p4801_p1 = scmp.lt.s32.totalorder %s4799_s14, %s4793_s29 }
 0x299   : > { %4495 = vmatprep.subr.bf16.mxu1 %v4494_v19  ;;  %v3308_v3 = vld [vmem:[%s6083_s3 + $0x518] sm:$0xff] }
 0x29a   : > { %4277 = vmatpush3.bf16.msra.mxu0 %v4274_v15  ;;  %v4530_v15 = vpack.c.bf16 %v3288_v14, %v3287_v13  ;;  %v3309_v13 = vld [vmem:[%s6083_s3 + $0x520] sm:$0xff]  ;;  %v3310_v14 = vld [vmem:[%s6083_s3 + $0x528] sm:$0xff]  ;;  %p4795_p12 = pnand %p4794_p11, %p4940_p5  ;;  %p4802_p2 = por %p4801_p1, %p4800_p0 }
 0x29b   : > { %4041 = vmatmul.mubr.msk.f32.vlgmr.msra.gmra.mrb[0].mxu1 %vm519_vm5, %v5195_v7  ;;  %4279 = vmatprep.subr.bf16.mxu0 %v4278_v23 }
 0x29c   : > { %4497 = vmatpush3.bf16.msra.mxu1 %v4494_v19  ;;  %4059 = vmatprep.mubr.msk.f32.mxu1 %vm519_vm5, %v5134_v42  ;;  %v4286_v42 = vpack.c.bf16 %v3136_v34, %v3135_v33  ;;  %v4534_v19 = vpack.c.bf16 %v3290_v18, %v3289_v17  ;;  %v3298_v33 = vld [vmem:[%s6083_s3 + $0x4d8] sm:$0xff]  ;;  %v4566_v17 = vpack.c.bf16 %v3310_v14, %v3309_v13  ;;  %v3161_v18 = vld [vmem:[%s6083_s3 + $0x170] sm:$0xff]  ;;  %v3185_v14 = vld [vmem:[%s6083_s3 + $0x200] sm:$0xff]  ;;  %p4796_p13 = pneg %p4795_p12 }
 0x29d   : > { %4499 = vmatprep.subr.bf16.mxu1 %v4498_v28 }
 0x29e   : > { %4281 = vmatpush3.bf16.msra.mxu0 %v4278_v23  ;;  %v4538_v23 = vpack.c.bf16 %v3292_v22, %v3291_v21  ;;  %v3312_v21 = vld [vmem:[%s6083_s3 + $0x538] sm:$0xff]  ;;  %p4803_p3 = pnand %p4802_p2, %p4796_p13 }
 0x29f   : > { %4283 = vmatprep.subr.bf16.mxu0 %v4282_v32 }
 0x2a0   : > { %4501 = vmatpush3.bf16.msra.mxu1 %v4498_v28 }
 0x2a1   : > { %4503 = vmatprep.subr.bf16.mxu1 %v4502_v35 }
 0x2a2   : > { %4285 = vmatpush3.bf16.msra.mxu0 %v4282_v32  ;;  %v3297_v32 = vld [vmem:[%s6083_s3 + $0x4d0] sm:$0xff] }
 0x2a3   : > { %4287 = vmatprep.subr.bf16.mxu0 %v4286_v42  ;;  %v4546_v37 = vpack.c.bf16 %v3298_v33, %v3297_v32  ;;  %v3168_v32 = vld [vmem:[%s6083_s3 + $0x198] sm:$0xff]  ;;  %v3317_v33 = vld [vmem:[%s6083_s3 + $0x550] sm:$0xff] }
 0x2a4   : > { %4505 = vmatpush3.bf16.msra.mxu1 %v4502_v35  ;;  %v4306_v35 = vpack.c.bf16 %v3148_v31, %v3147_v30  ;;  %v3167_v31 = vld [vmem:[%s6083_s3 + $0x190] sm:$0xff] }
 0x2a5   : > { %3794 = vmatmul.mubr.msk.f32.vlgmr.msra.gmra.mrb[8].mxu0 %vm519_vm5, %v5410_v50  ;;  %4507 = vmatprep.subr.bf16.mxu1 %v4506_v45 }
 0x2a6   : > { %4289 = vmatpush3.bf16.msra.mxu0 %v4286_v42  ;;  %v3150_v42 = vld [vmem:[%s6083_s3 + $0x128] sm:$0xff] }
 0x2a7   : > { %4291 = vmatprep.subr.bf16.mxu0 %v4290_v49  ;;  %v4310_v46 = vpack.c.bf16 %v3150_v42, %v3149_v38  ;;  %v3169_v38 = vld [vmem:[%s6083_s3 + $0x1a0] sm:$0xff]  ;;  %v3170_v42 = vld [vmem:[%s6083_s3 + $0x1a8] sm:$0xff] }
 0x2a8   : > { %4509 = vmatpush3.bf16.msra.mxu1 %v4506_v45  ;;  %v3300_v45 = vld [vmem:[%s6083_s3 + $0x4e8] sm:$0xff] }
 0x2a9   : > { %4511 = vmatprep.subr.bf16.mxu1 %v4510_v53 }
 0x2aa   : > { %4293 = vmatpush3.bf16.msra.mxu0 %v4290_v49  ;;  %v4550_v49 = vpack.c.bf16 %v3300_v45, %v3299_v41  ;;  %v3319_v45 = vld [vmem:[%s6083_s3 + $0x560] sm:$0xff] }
 0x2ab   : > { %4060 = vmatmul.mubr.msk.f32.vlgmr.msra.gmra.mrb[0].mxu1 %vm519_vm5, %v5275_v44  ;;  %4295 = vmatprep.subr.bf16.mxu0 %v4294_v55 }
 0x2ac   : > { %4513 = vmatpush3.bf16.msra.mxu1 %v4510_v53  ;;  %4078 = vmatprep.mubr.msk.f32.mxu1 %vm519_vm5, %v5197_v9  ;;  %v4302_v9 = vpack.c.bf16 %v3146_v0, %v3145_v63  ;;  %v3152_v53 = vld [vmem:[%s6083_s3 + $0x138] sm:$0xff]  ;;  %v4318_v63 = vpack.c.bf16 %v3156_v58, %v3155_v57  ;;  %v4558_v0 = vpack.c.bf16 %v3306_v61, %v3305_v60  ;;  %v3327_v61 = vld [vmem:[%s6083_s3 + $0x590] sm:$0xff] }
 0x2ad   : > { %4515 = vmatprep.subr.bf16.mxu1 %v4514_v59  ;;  %v4314_v40 = vpack.c.bf16 %v3152_v53, %v3151_v51  ;;  %v3172_v51 = vld [vmem:[%s6083_s3 + $0x1b8] sm:$0xff] }
 0x2ae   : > { %4297 = vmatpush3.bf16.msra.mxu0 %v4294_v55  ;;  %v3178_v60 = vld [vmem:[%s6083_s3 + $0x1d8] sm:$0xff] }
 0x2af   : > { %4299 = vmatprep.subr.bf16.mxu0 %v4298_v62 }
 0x2b0   : > { %4517 = vmatpush3.bf16.msra.mxu1 %v4514_v59 }
 0x2b1   : > { %4519 = vmatprep.subr.bf16.mxu1 %v4518_v2 }
 0x2b2   : > { %4301 = vmatpush3.bf16.msra.mxu0 %v4298_v62 }
 0x2b3   : > { %4303 = vmatprep.subr.bf16.mxu0 %v4302_v9 }
 0x2b4   : > { %4521 = vmatpush3.bf16.msra.mxu1 %v4518_v2  ;;  %v3157_v2 = vld [vmem:[%s6083_s3 + $0x150] sm:$0xff] }
 0x2b5   : > { %4523 = vmatprep.subr.bf16.mxu1 %v4522_v6 }
 0x2b8   : > { %4525 = vmatpush3.bf16.msra.mxu1 %v4522_v6  ;;  %v3159_v6 = vld [vmem:[%s6083_s3 + $0x160] sm:$0xff] }
 0x2b9   : > { %4527 = vmatprep.subr.bf16.mxu1 %v4526_v11 }
 0x2bb   : > { %4079 = vmatmul.mubr.msk.f32.vlgmr.msra.gmra.mrb[0].mxu1 %vm519_vm5, %v5466_v16 }
 0x2bc   : > { %4097 = vmatprep.mubr.msk.f32.mxu1 %vm519_vm5, %v5231_v24  ;;  %4529 = vmatpush3.bf16.msra.mxu1 %v4526_v11  ;;  %v3296_v24 = vld [vmem:[%s6083_s3 + $0x4c8] sm:$0xff] }
 0x2bd   : > { %4531 = vmatprep.subr.bf16.mxu1 %v4530_v15  ;;  %v4542_v27 = vpack.c.bf16 %v3296_v24, %v3295_v26  ;;  %v3166_v26 = vld [vmem:[%s6083_s3 + $0x188] sm:$0xff]  ;;  %v3315_v24 = vld [vmem:[%s6083_s3 + $0x540] sm:$0xff] }
 0x2c0   : > { %4533 = vmatpush3.bf16.msra.mxu1 %v4530_v15  ;;  %v4326_v15 = vpack.c.bf16 %v3160_v8, %v3159_v6  ;;  %v3181_v8 = vld [vmem:[%s6083_s3 + $0x1f0] sm:$0xff] }
 0x2c1   : > { %4535 = vmatprep.subr.bf16.mxu1 %v4534_v19 }
 0x2c4   : > { %4537 = vmatpush3.bf16.msra.mxu1 %v4534_v19  ;;  %v3162_v19 = vld [vmem:[%s6083_s3 + $0x178] sm:$0xff] }
 0x2c5   : > { %4539 = vmatprep.subr.bf16.mxu1 %v4538_v23 }
 0x2c8   : > { %4541 = vmatpush3.bf16.msra.mxu1 %v4538_v23  ;;  %v3165_v23 = vld [vmem:[%s6083_s3 + $0x180] sm:$0xff] }
 0x2c9   : > { %4543 = vmatprep.subr.bf16.mxu1 %v4542_v27 }
 0x2f2   : > { %v786_v28 = vpop.permute.xlu0 %785 }
 0x2f3   : > { %3812 = vmatprep.mubr.msk.f32.mxu0 %vm519_vm5, %v786_v28  ;;  %v4334_v28 = vpack.c.bf16 %v3166_v26, %v3165_v23  ;;  %v3338_v23 = vld [vmem:[%s6083_s3 + $0x5d8] sm:$0xff] }
 0x2f6   : > { %v5503_v34 = vpop.permute.xlu1 %787 }
 0x2f7   : > { %v5511_v39 = vpop.permute.xlu0 %2167  ;;  %3813 = vmatmul.mubr.msk.f32.vlgmr.msra.gmra.mrb[8].mxu0 %vm519_vm5, %v5503_v34 }
 0x2f8   : > { %4305 = vmatpush3.bf16.msra.mxu0 %v4302_v9  ;;  %4098 = vmatmul.mubr.msk.f32.vlgmr.msra.gmra.mrb[0].mxu1 %vm519_vm5, %v5511_v39  ;;  %v4322_v9 = vpack.c.bf16 %v3158_v12, %v3157_v2  ;;  %v3179_v2 = vld [vmem:[%s6083_s3 + $0x1e0] sm:$0xff]  ;;  %v3180_v12 = vld [vmem:[%s6083_s3 + $0x1e8] sm:$0xff] }
 0x2f9   : > { %4545 = vmatpush3.bf16.msra.mxu1 %v4542_v27  ;;  %4116 = vmatprep.mubr.msk.f32.mxu1 %vm519_vm5, %v5245_v29  ;;  %v3301_v29 = vld [vmem:[%s6083_s3 + $0x4f0] sm:$0xff]  ;;  %v3316_v27 = vld [vmem:[%s6083_s3 + $0x548] sm:$0xff]  ;;  %v4358_v6 = vpack.c.bf16 %v3180_v12, %v3179_v2 }
 0x2fa   : > { %v880_v48 = vpop.permute.xlu1 %879  ;;  %4307 = vmatprep.subr.bf16.mxu0 %v4306_v35  ;;  %4547 = vmatprep.subr.bf16.mxu1 %v4546_v37  ;;  %v4554_v55 = vpack.c.bf16 %v3302_v54, %v3301_v29  ;;  %v4574_v30 = vpack.c.bf16 %v3316_v27, %v3315_v24  ;;  %v3175_v29 = vld [vmem:[%s6083_s3 + $0x1c0] sm:$0xff]  ;;  %v3176_v54 = vld [vmem:[%s6083_s3 + $0x1c8] sm:$0xff] }
 0x2fb   : > { %v5528_v52 = vpop.permute.xlu0 %881  ;;  %3831 = vmatprep.mubr.msk.f32.mxu0 %vm519_vm5, %v880_v48  ;;  %v4342_v48 = vpack.c.bf16 %v3170_v42, %v3169_v38  ;;  %v4350_v57 = vpack.c.bf16 %v3176_v54, %v3175_v29  ;;  %v3189_v24 = vld [vmem:[%s6083_s3 + $0x220] sm:$0xff]  ;;  %v3190_v27 = vld [vmem:[%s6083_s3 + $0x228] sm:$0xff]  ;;  %v3201_v54 = vld [vmem:[%s6083_s3 + $0x270] sm:$0xff] }
 0x2fc   : > { %4309 = vmatpush3.bf16.msra.mxu0 %v4306_v35  ;;  %v3318_v35 = vld [vmem:[%s6083_s3 + $0x558] sm:$0xff]  ;;  %v3195_v42 = vld [vmem:[%s6083_s3 + $0x240] sm:$0xff]  ;;  %v2839_v12 = vld [vmem:[%s6085_s5 + $0x88] sm:$0xff] }
 0x2fd   : > { %4549 = vmatpush3.bf16.msra.mxu1 %v4546_v37  ;;  %4311 = vmatprep.subr.bf16.mxu0 %v4310_v46  ;;  %v4338_v37 = vpack.c.bf16 %v3168_v32, %v3167_v31  ;;  %v4578_v41 = vpack.c.bf16 %v3318_v35, %v3317_v33  ;;  %v3339_v31 = vld [vmem:[%s6083_s3 + $0x5e0] sm:$0xff]  ;;  %v3340_v32 = vld [vmem:[%s6083_s3 + $0x5e8] sm:$0xff]  ;;  %v4374_v33 = vpack.c.bf16 %v3190_v27, %v3189_v24  ;;  %v3192_v35 = vld [vmem:[%s6083_s3 + $0x238] sm:$0xff] }
 0x2fe   : > { %4551 = vmatprep.subr.bf16.mxu1 %v4550_v49  ;;  %v2846_v24 = vld [vmem:[%s6085_s5 + $0xc0] sm:$0xff]  ;;  %v2847_v27 = vld [vmem:[%s6085_s5 + $0xc8] sm:$0xff] }
 0x2ff   : > { %v2434_v59 = vpop.permute.xlu0 %2433  ;;  %v5576_v10 = vpop.permute.xlu1 %2257 }
 0x300   : > { %4313 = vmatpush3.bf16.msra.mxu0 %v4310_v46  ;;  %v5554_v62 = vsel %vm322_vm1, %v5308_v56, %v2434_v59  ;;  %v3307_v56 = vld [vmem:[%s6083_s3 + $0x510] sm:$0xff]  ;;  %v3320_v46 = vld [vmem:[%s6083_s3 + $0x568] sm:$0xff] }
 0x301   : > { %4553 = vmatpush3.bf16.msra.mxu1 %v4550_v49  ;;  %2625 = vrot.lane.b32.xlu0 %v5554_v62, %s4859_s8  ;;  %v4562_v11 = vpack.c.bf16 %v3308_v3, %v3307_v56  ;;  %v3171_v49 = vld [vmem:[%s6083_s3 + $0x1b0] sm:$0xff]  ;;  %v3329_v3 = vld [vmem:[%s6083_s3 + $0x5a0] sm:$0xff] }
 0x302   : > { %4315 = vmatprep.subr.bf16.mxu0 %v4314_v40  ;;  %4555 = vmatprep.subr.bf16.mxu1 %v4554_v55  ;;  %v3177_v59 = vld [vmem:[%s6083_s3 + $0x1d0] sm:$0xff] }
 0x304   : > { %4317 = vmatpush3.bf16.msra.mxu0 %v4314_v40  ;;  %v3325_v40 = vld [vmem:[%s6083_s3 + $0x580] sm:$0xff] }
 0x305   : > { %4557 = vmatpush3.bf16.msra.mxu1 %v4554_v55  ;;  %4319 = vmatprep.subr.bf16.mxu0 %v4318_v63  ;;  %v3326_v55 = vld [vmem:[%s6083_s3 + $0x588] sm:$0xff] }
 0x306   : > { %4559 = vmatprep.subr.bf16.mxu1 %v4558_v0  ;;  %v4590_v58 = vpack.c.bf16 %v3326_v55, %v3325_v40  ;;  %v3202_v40 = vld [vmem:[%s6083_s3 + $0x278] sm:$0xff] }
 0x307   : > { %3832 = vmatmul.mubr.msk.f32.vlgmr.msra.gmra.mrb[8].mxu0 %vm519_vm5, %v5528_v52  ;;  %v4394_v55 = vpack.c.bf16 %v3202_v40, %v3201_v54 }
 0x308   : > { %4117 = vmatmul.mubr.msk.f32.vlgmr.msra.gmra.mrb[0].mxu1 %vm519_vm5, %v5576_v10  ;;  %4321 = vmatpush3.bf16.msra.mxu0 %v4318_v63  ;;  %v3328_v63 = vld [vmem:[%s6083_s3 + $0x598] sm:$0xff] }
 0x309   : > { %3850 = vmatprep.mubr.msk.f32.mxu0 %vm519_vm5, %v5181_v1  ;;  %4561 = vmatpush3.bf16.msra.mxu1 %v4558_v0  ;;  %v3311_v1 = vld [vmem:[%s6083_s3 + $0x530] sm:$0xff]  ;;  %v4354_v0 = vpack.c.bf16 %v3178_v60, %v3177_v59  ;;  %v4594_v56 = vpack.c.bf16 %v3328_v63, %v3327_v61  ;;  %v3349_v59 = vld [vmem:[%s6083_s3 + $0x620] sm:$0xff]  ;;  %v3350_v60 = vld [vmem:[%s6083_s3 + $0x628] sm:$0xff] }
 0x30a   : > { %4135 = vmatprep.mubr.msk.f32.mxu1 %vm519_vm5, %v5195_v7  ;;  %4323 = vmatprep.subr.bf16.mxu0 %v4322_v9  ;;  %v4330_v7 = vpack.c.bf16 %v3162_v19, %v3161_v18  ;;  %v4570_v22 = vpack.c.bf16 %v3312_v21, %v3311_v1  ;;  %v3336_v18 = vld [vmem:[%s6083_s3 + $0x5c8] sm:$0xff]  ;;  %v3187_v21 = vld [vmem:[%s6083_s3 + $0x210] sm:$0xff]  ;;  %v3352_v63 = vld [vmem:[%s6083_s3 + $0x638] sm:$0xff] }
 0x30b   : > { %4563 = vmatprep.subr.bf16.mxu1 %v4562_v11  ;;  %v3351_v61 = vld [vmem:[%s6083_s3 + $0x630] sm:$0xff] }
 0x30c   : > { %4325 = vmatpush3.bf16.msra.mxu0 %v4322_v9  ;;  %v3330_v9 = vld [vmem:[%s6083_s3 + $0x5a8] sm:$0xff] }
 0x30d   : > { %4565 = vmatpush3.bf16.msra.mxu1 %v4562_v11  ;;  %4327 = vmatprep.subr.bf16.mxu0 %v4326_v15  ;;  %v3182_v11 = vld [vmem:[%s6083_s3 + $0x1f8] sm:$0xff] }
 0x30e   : > { %4567 = vmatprep.subr.bf16.mxu1 %v4566_v17 }
 0x310   : > { %4329 = vmatpush3.bf16.msra.mxu0 %v4326_v15  ;;  %v3186_v15 = vld [vmem:[%s6083_s3 + $0x208] sm:$0xff] }
 0x311   : > { %4569 = vmatpush3.bf16.msra.mxu1 %v4566_v17  ;;  %4331 = vmatprep.subr.bf16.mxu0 %v4330_v7  ;;  %v3335_v17 = vld [vmem:[%s6083_s3 + $0x5c0] sm:$0xff]  ;;  %v4366_v19 = vpack.c.bf16 %v3186_v15, %v3185_v14 }
 0x312   : > { %4571 = vmatprep.subr.bf16.mxu1 %v4570_v22  ;;  %v4606_v1 = vpack.c.bf16 %v3336_v18, %v3335_v17  ;;  %v2826_v17 = vld [vmem:[%s6085_s5 + $0x20] sm:$0xff]  ;;  %v2827_v18 = vld [vmem:[%s6085_s5 + $0x28] sm:$0xff] }
 0x314   : > { %4333 = vmatpush3.bf16.msra.mxu0 %v4330_v7  ;;  %v3188_v7 = vld [vmem:[%s6083_s3 + $0x218] sm:$0xff] }
 0x315   : > { %4573 = vmatpush3.bf16.msra.mxu1 %v4570_v22  ;;  %4335 = vmatprep.subr.bf16.mxu0 %v4334_v28  ;;  %v3337_v22 = vld [vmem:[%s6083_s3 + $0x5d0] sm:$0xff]  ;;  %v4370_v26 = vpack.c.bf16 %v3188_v7, %v3187_v21  ;;  %v4648_v21 = vpack.c.bf16 %v2827_v18, %v2826_v17  ;;  %v2858_v17 = vld [vmem:[%s6085_s5 + $0x120] sm:$0xff]  ;;  %v2859_v18 = vld [vmem:[%s6085_s5 + $0x128] sm:$0xff] }
 0x316   : > { %4575 = vmatprep.subr.bf16.mxu1 %v4574_v30 }
 0x317   : > { %3851 = vmatmul.mubr.msk.f32.vlgmr.msra.gmra.mrb[8].mxu0 %vm519_vm5, %v5049_v4  ;;  %v4582_v4 = vpack.c.bf16 %v3320_v46, %v3319_v45  ;;  %v3345_v46 = vld [vmem:[%s6083_s3 + $0x600] sm:$0xff] }
 0x318   : > { %4136 = vmatmul.mubr.msk.f32.vlgmr.msra.gmra.mrb[0].mxu1 %vm519_vm5, %v5334_v5  ;;  %4337 = vmatpush3.bf16.msra.mxu0 %v4334_v28  ;;  %v3322_v5 = vld [vmem:[%s6083_s3 + $0x578] sm:$0xff]  ;;  %v2536_v28 = vpop.permute.xlu1 %2535 }
 0x319   : > { %3869 = vmatprep.mubr.msk.f32.mxu0 %vm519_vm5, %v5271_v43  ;;  %4577 = vmatpush3.bf16.msra.mxu1 %v4574_v30  ;;  %v3321_v43 = vld [vmem:[%s6083_s3 + $0x570] sm:$0xff]  ;;  %v4610_v30 = vpack.c.bf16 %v3338_v23, %v3337_v22  ;;  %v2829_v23 = vld [vmem:[%s6085_s5 + $0x38] sm:$0xff] }
 0x31a   : > { %4154 = vmatprep.mubr.msk.f32.mxu1 %vm519_vm5, %v5275_v44  ;;  %4339 = vmatprep.subr.bf16.mxu0 %v4338_v37  ;;  %v4346_v44 = vpack.c.bf16 %v3172_v51, %v3171_v49  ;;  %v4586_v53 = vpack.c.bf16 %v3322_v5, %v3321_v43  ;;  %v3197_v49 = vld [vmem:[%s6083_s3 + $0x250] sm:$0xff]  ;;  %v3198_v51 = vld [vmem:[%s6083_s3 + $0x258] sm:$0xff] }
 0x31b   : > { %4579 = vmatprep.subr.bf16.mxu1 %v4578_v41  ;;  %v4386_v5 = vpack.c.bf16 %v3198_v51, %v3197_v49  ;;  %v2828_v22 = vld [vmem:[%s6085_s5 + $0x30] sm:$0xff]  ;;  %v2853_v49 = vld [vmem:[%s6085_s5 + $0xf8] sm:$0xff] }
 0x31c   : > { %4341 = vmatpush3.bf16.msra.mxu0 %v4338_v37  ;;  %v4614_v37 = vpack.c.bf16 %v3340_v32, %v3339_v31  ;;  %v2716_v2 = vpop.permute.xlu1 %2715  ;;  %v2831_v31 = vld [vmem:[%s6085_s5 + $0x48] sm:$0xff] }
 0x31d   : > { %4581 = vmatpush3.bf16.msra.mxu1 %v4578_v41  ;;  %4343 = vmatprep.subr.bf16.mxu0 %v4342_v48  ;;  %v3196_v41 = vld [vmem:[%s6083_s3 + $0x248] sm:$0xff] }
 0x31e   : > { %4583 = vmatprep.subr.bf16.mxu1 %v4582_v4 }
 0x320   : > { %4345 = vmatpush3.bf16.msra.mxu0 %v4342_v48  ;;  %v3346_v48 = vld [vmem:[%s6083_s3 + $0x608] sm:$0xff] }
 0x321   : > { %4585 = vmatpush3.bf16.msra.mxu1 %v4582_v4  ;;  %4347 = vmatprep.subr.bf16.mxu0 %v4346_v44  ;;  %v4382_v4 = vpack.c.bf16 %v3196_v41, %v3195_v42  ;;  %v4622_v43 = vpack.c.bf16 %v3346_v48, %v3345_v46  ;;  %v2851_v42 = vld [vmem:[%s6085_s5 + $0xe8] sm:$0xff] }
 0x322   : > { %4587 = vmatprep.subr.bf16.mxu1 %v4586_v53  ;;  %v2835_v46 = vld [vmem:[%s6085_s5 + $0x68] sm:$0xff] }
 0x324   : > { %4349 = vmatpush3.bf16.msra.mxu0 %v4346_v44  ;;  %v3199_v44 = vld [vmem:[%s6083_s3 + $0x260] sm:$0xff] }
 0x325   : > { %4589 = vmatpush3.bf16.msra.mxu1 %v4586_v53  ;;  %4351 = vmatprep.subr.bf16.mxu0 %v4350_v57  ;;  %v3200_v53 = vld [vmem:[%s6083_s3 + $0x268] sm:$0xff] }
 0x326   : > { %4591 = vmatprep.subr.bf16.mxu1 %v4590_v58  ;;  %v4390_v29 = vpack.c.bf16 %v3200_v53, %v3199_v44  ;;  %v2870_v53 = vld [vmem:[%s6085_s5 + $0x180] sm:$0xff] }
 0x327   : > { %3870 = vmatmul.mubr.msk.f32.vlgmr.msra.gmra.mrb[8].mxu0 %vm519_vm5, %v5115_v36  ;;  %v4598_v36 = vpack.c.bf16 %v3330_v9, %v3329_v3  ;;  %v2823_v9 = vld [vmem:[%s6085_s5 + $0x8] sm:$0xff] }
 0x328   : > { %4155 = vmatmul.mubr.msk.f32.vlgmr.msra.gmra.mrb[0].mxu1 %vm519_vm5, %v5554_v62  ;;  %4353 = vmatpush3.bf16.msra.mxu0 %v4350_v57  ;;  %v3332_v62 = vld [vmem:[%s6083_s3 + $0x5b8] sm:$0xff] }
 0x329   : > { %3888 = vmatprep.mubr.msk.f32.mxu0 %vm519_vm5, %v5410_v50  ;;  %4593 = vmatpush3.bf16.msra.mxu1 %v4590_v58  ;;  %v3331_v50 = vld [vmem:[%s6083_s3 + $0x5b0] sm:$0xff] }
 0x32a   : > { %4173 = vmatprep.mubr.msk.f32.mxu1 %vm519_vm5, %v5466_v16  ;;  %4355 = vmatprep.subr.bf16.mxu0 %v4354_v0  ;;  %v4362_v16 = vpack.c.bf16 %v3182_v11, %v3181_v8  ;;  %v4602_v13 = vpack.c.bf16 %v3332_v62, %v3331_v50  ;;  %v2824_v50 = vld [vmem:[%s6085_s5 + $0x10] sm:$0xff]  ;;  %v2825_v62 = vld [vmem:[%s6085_s5 + $0x18] sm:$0xff] }
 0x32b   : > { %4595 = vmatprep.subr.bf16.mxu1 %v4594_v56  ;;  %v4644_v14 = vpack.c.bf16 %v2825_v62, %v2824_v50  ;;  %v2857_v50 = vld [vmem:[%s6085_s5 + $0x118] sm:$0xff] }
 0x32c   : > { %4357 = vmatpush3.bf16.msra.mxu0 %v4354_v0  ;;  %v4634_v0 = vpack.c.bf16 %v3352_v63, %v3351_v61  ;;  %v3355_v63 = vld [vmem:[%s6084_s4] ss:$0 sm:$0xff] }
 0x32d   : > { %4597 = vmatpush3.bf16.msra.mxu1 %v4594_v56  ;;  %4359 = vmatprep.subr.bf16.mxu0 %v4358_v6  ;;  %v2822_v56 = vld [vmem:[%s6085_s5] sm:$0xff] }
 0x32e   : > { %4599 = vmatprep.subr.bf16.mxu1 %v4598_v36  ;;  %v4640_v8 = vpack.c.bf16 %v2823_v9, %v2822_v56  ;;  %v2873_v9 = vld [vmem:[%s6085_s5 + $0x198] sm:$0xff] }
 0x330   : > { %4361 = vmatpush3.bf16.msra.mxu0 %v4358_v6  ;;  %v2840_v6 = vld [vmem:[%s6085_s5 + $0x90] sm:$0xff] }
 0x331   : > { %4601 = vmatpush3.bf16.msra.mxu1 %v4598_v36  ;;  %4363 = vmatprep.subr.bf16.mxu0 %v4362_v16  ;;  %v2841_v36 = vld [vmem:[%s6085_s5 + $0x98] sm:$0xff] }
 0x332   : > { %4603 = vmatprep.subr.bf16.mxu1 %v4602_v13  ;;  %v4642_v11 = vpack.c.bf16 %v2841_v36, %v2840_v6 }
 0x334   : > { %4365 = vmatpush3.bf16.msra.mxu0 %v4362_v16  ;;  %v2842_v16 = vld [vmem:[%s6085_s5 + $0xa0] sm:$0xff] }
 0x335   : > { %4605 = vmatpush3.bf16.msra.mxu1 %v4602_v13  ;;  %4367 = vmatprep.subr.bf16.mxu0 %v4366_v19  ;;  %v2843_v13 = vld [vmem:[%s6085_s5 + $0xa8] sm:$0xff] }
 0x336   : > { %4607 = vmatprep.subr.bf16.mxu1 %v4606_v1  ;;  %v4646_v15 = vpack.c.bf16 %v2843_v13, %v2842_v16  ;;  %v2874_v16 = vld [vmem:[%s6085_s5 + $0x1a0] sm:$0xff]  ;;  %v2875_v13 = vld [vmem:[%s6085_s5 + $0x1a8] sm:$0xff] }
 0x337   : > { %3889 = vmatmul.mubr.msk.f32.vlgmr.msra.gmra.mrb[8].mxu0 %vm519_vm5, %v5146_v47  ;;  %v3191_v47 = vld [vmem:[%s6083_s3 + $0x230] sm:$0xff] }
 0x338   : > { %4174 = vmatmul.mubr.msk.f32.vlgmr.msra.gmra.mrb[0].mxu1 %vm519_vm5, %v2536_v28  ;;  %4369 = vmatpush3.bf16.msra.mxu0 %v4366_v19  ;;  %v4378_v38 = vpack.c.bf16 %v3192_v35, %v3191_v47  ;;  %v2844_v19 = vld [vmem:[%s6085_s5 + $0xb0] sm:$0xff]  ;;  %v4654_v28 = vpack.c.bf16 %v2847_v27, %v2846_v24  ;;  %v2849_v47 = vld [vmem:[%s6085_s5 + $0xd8] sm:$0xff]  ;;  %v2879_v24 = vld [vmem:[%s6085_s5 + $0x1c8] sm:$0xff] }
 0x339   : > { %3907 = vmatprep.mubr.msk.f32.mxu0 %vm519_vm5, %v5503_v34  ;;  %4192 = vmatprep.mubr.msk.f32.mxu1 %vm519_vm5, %v5511_v39  ;;  %v3341_v34 = vld [vmem:[%s6083_s3 + $0x5f0] sm:$0xff]  ;;  %v3342_v39 = vld [vmem:[%s6083_s3 + $0x5f8] sm:$0xff] }
 0x33a   : > { %4371 = vmatprep.subr.bf16.mxu0 %v4370_v26  ;;  %4609 = vmatpush3.bf16.msra.mxu1 %v4606_v1  ;;  %v4618_v45 = vpack.c.bf16 %v3342_v39, %v3341_v34  ;;  %v2845_v1 = vld [vmem:[%s6085_s5 + $0xb8] sm:$0xff] }
 0x33b   : > { %4611 = vmatprep.subr.bf16.mxu1 %v4610_v30  ;;  %v4650_v7 = vpack.c.bf16 %v2845_v1, %v2844_v19  ;;  %v2833_v34 = vld [vmem:[%s6085_s5 + $0x58] sm:$0xff]  ;;  %v2876_v19 = vld [vmem:[%s6085_s5 + $0x1b0] sm:$0xff] }
 0x33c   : > { %4373 = vmatpush3.bf16.msra.mxu0 %v4370_v26  ;;  %v4652_v26 = vpack.c.bf16 %v2829_v23, %v2828_v22  ;;  %v2877_v1 = vld [vmem:[%s6085_s5 + $0x1b8] sm:$0xff]  ;;  %v2860_v22 = vld [vmem:[%s6085_s5 + $0x130] sm:$0xff] }
 0x33d   : > { %4375 = vmatprep.subr.bf16.mxu0 %v4374_v33  ;;  %v2861_v23 = vld [vmem:[%s6085_s5 + $0x138] sm:$0xff] }
 0x33e   : > { %4613 = vmatpush3.bf16.msra.mxu1 %v4610_v30  ;;  %v2830_v30 = vld [vmem:[%s6085_s5 + $0x40] sm:$0xff]  ;;  %v4684_v27 = vpack.c.bf16 %v2861_v23, %v2860_v22 }
 0x33f   : > { %4615 = vmatprep.subr.bf16.mxu1 %v4614_v37  ;;  %v4656_v32 = vpack.c.bf16 %v2831_v31, %v2830_v30  ;;  %v2862_v30 = vld [vmem:[%s6085_s5 + $0x140] sm:$0xff]  ;;  %v2863_v31 = vld [vmem:[%s6085_s5 + $0x148] sm:$0xff] }
 0x340   : > { %4377 = vmatpush3.bf16.msra.mxu0 %v4374_v33  ;;  %v2848_v33 = vld [vmem:[%s6085_s5 + $0xd0] sm:$0xff] }
 0x341   : > { %4379 = vmatprep.subr.bf16.mxu0 %v4378_v38  ;;  %v4658_v35 = vpack.c.bf16 %v2849_v47, %v2848_v33  ;;  %v2881_v33 = vld [vmem:[%s6085_s5 + $0x1d8] sm:$0xff]  ;;  %v4688_v47 = vpack.c.bf16 %v2863_v31, %v2862_v30 }
 0x342   : > { %4617 = vmatpush3.bf16.msra.mxu1 %v4614_v37  ;;  %v2832_v37 = vld [vmem:[%s6085_s5 + $0x50] sm:$0xff] }
 0x343   : > { %4619 = vmatprep.subr.bf16.mxu1 %v4618_v45  ;;  %v4660_v39 = vpack.c.bf16 %v2833_v34, %v2832_v37  ;;  %v2864_v37 = vld [vmem:[%s6085_s5 + $0x150] sm:$0xff]  ;;  %v2865_v34 = vld [vmem:[%s6085_s5 + $0x158] sm:$0xff] }
 0x344   : > { %4381 = vmatpush3.bf16.msra.mxu0 %v4378_v38  ;;  %v2850_v38 = vld [vmem:[%s6085_s5 + $0xe0] sm:$0xff] }
 0x345   : > { %4383 = vmatprep.subr.bf16.mxu0 %v4382_v4  ;;  %v4662_v41 = vpack.c.bf16 %v2851_v42, %v2850_v38  ;;  %v2883_v38 = vld [vmem:[%s6085_s5 + $0x1e8] sm:$0xff]  ;;  %v4692_v42 = vpack.c.bf16 %v2865_v34, %v2864_v37 }
 0x346   : > { %4621 = vmatpush3.bf16.msra.mxu1 %v4618_v45  ;;  %v2834_v45 = vld [vmem:[%s6085_s5 + $0x60] sm:$0xff] }
 0x347   : > { %3908 = vmatmul.mubr.msk.f32.vlgmr.msra.gmra.mrb[8].mxu0 %vm519_vm5, %v5221_v20  ;;  %4623 = vmatprep.subr.bf16.mxu1 %v4622_v43  ;;  %v3347_v20 = vld [vmem:[%s6083_s3 + $0x610] sm:$0xff]  ;;  %v4664_v48 = vpack.c.bf16 %v2835_v46, %v2834_v45  ;;  %v2866_v45 = vld [vmem:[%s6085_s5 + $0x160] sm:$0xff]  ;;  %v2867_v46 = vld [vmem:[%s6085_s5 + $0x168] sm:$0xff] }
 0x348   : > { %4385 = vmatpush3.bf16.msra.mxu0 %v4382_v4  ;;  %3926 = vmatprep.mubr.msk.f32.mxu0 %vm519_vm5, %v5528_v52  ;;  %v3348_v52 = vld [vmem:[%s6083_s3 + $0x618] sm:$0xff]  ;;  %v2852_v4 = vld [vmem:[%s6085_s5 + $0xf0] sm:$0xff] }
 0x349   : > { %4387 = vmatprep.subr.bf16.mxu0 %v4386_v5  ;;  %v4626_v57 = vpack.c.bf16 %v3348_v52, %v3347_v20  ;;  %v4666_v51 = vpack.c.bf16 %v2853_v49, %v2852_v4  ;;  %v2885_v4 = vld [vmem:[%s6085_s5 + $0x1f8] sm:$0xff]  ;;  %v4696_v49 = vpack.c.bf16 %v2867_v46, %v2866_v45 }
 0x34c   : > { %4389 = vmatpush3.bf16.msra.mxu0 %v4386_v5  ;;  %v2837_v5 = vld [vmem:[%s6085_s5 + $0x78] sm:$0xff] }
 0x34d   : > { %4391 = vmatprep.subr.bf16.mxu0 %v4390_v29 }
 0x350   : > { %4393 = vmatpush3.bf16.msra.mxu0 %v4390_v29  ;;  %v2871_v29 = vld [vmem:[%s6085_s5 + $0x188] sm:$0xff] }
 0x351   : > { %4395 = vmatprep.subr.bf16.mxu0 %v4394_v55  ;;  %v4670_v54 = vpack.c.bf16 %v2871_v29, %v2870_v53 }
 0x354   : > { %4397 = vmatpush3.bf16.msra.mxu0 %v4394_v55 }
 0x357   : > { %3927 = vmatmul.mubr.msk.f32.vlgmr.msra.gmra.mrb[8].mxu0 %vm519_vm5, %v5233_v25  ;;  %v4630_v25 = vpack.c.bf16 %v3350_v60, %v3349_v59 }
 0x373   : > { %v2626_v58 = vpop.permute.xlu0 %2625 }
 0x374   : > { %4193 = vmatmul.mubr.msk.f32.vlgmr.msra.gmra.mrb[0].mxu1 %vm519_vm5, %v2626_v58 }
 0x375   : > { %4625 = vmatpush3.bf16.msra.mxu1 %v4622_v43  ;;  %4211 = vmatprep.mubr.msk.f32.mxu1 %vm519_vm5, %v5576_v10  ;;  %v2838_v10 = vld [vmem:[%s6085_s5 + $0x80] sm:$0xff]  ;;  %v2836_v43 = vld [vmem:[%s6085_s5 + $0x70] sm:$0xff] }
 0x376   : > { %4627 = vmatprep.subr.bf16.mxu1 %v4626_v57  ;;  %v4638_v3 = vpack.c.bf16 %v2839_v12, %v2838_v10  ;;  %v4668_v44 = vpack.c.bf16 %v2837_v5, %v2836_v43  ;;  %v2854_v10 = vld [vmem:[%s6085_s5 + $0x100] sm:$0xff]  ;;  %v2855_v12 = vld [vmem:[%s6085_s5 + $0x108] sm:$0xff]  ;;  %v2868_v43 = vld [vmem:[%s6085_s5 + $0x170] sm:$0xff] }
 0x377   : > { %v4672_v36 = vpack.c.bf16 %v2855_v12, %v2854_v10  ;;  %v2869_v5 = vld [vmem:[%s6085_s5 + $0x178] sm:$0xff] }
 0x378   : > { %4639 = vmatprep.subr.bf16.mxu0 %v4638_v3  ;;  %v2872_v3 = vld [vmem:[%s6085_s5 + $0x190] sm:$0xff] }
 0x379   : > { %4629 = vmatpush3.bf16.msra.mxu1 %v4626_v57  ;;  %4641 = vmatpush3.bf16.msra.mxu0 %v4640_v8  ;;  %v4674_v8 = vpack.c.bf16 %v2873_v9, %v2872_v3 }
 0x37a   : > { %4631 = vmatprep.subr.bf16.mxu1 %v4630_v25  ;;  %4643 = vmatprep.subr.bf16.mxu0 %v4642_v11  ;;  %v2856_v11 = vld [vmem:[%s6085_s5 + $0x110] sm:$0xff] }
 0x37d   : > { %4633 = vmatpush3.bf16.msra.mxu1 %v4630_v25  ;;  %4645 = vmatpush3.bf16.msra.mxu0 %v4644_v14  ;;  %v4676_v14 = vpack.c.bf16 %v2857_v50, %v2856_v11 }
 0x37e   : > { %4635 = vmatprep.subr.bf16.mxu1 %v4634_v0  ;;  %4647 = vmatprep.subr.bf16.mxu0 %v4646_v15  ;;  %v4678_v15 = vpack.c.bf16 %v2875_v13, %v2874_v16 }
 0x381   : > { %4637 = vmatpush3.bf16.msra.mxu1 %v4634_v0  ;;  %4649 = vmatpush3.bf16.msra.mxu0 %v4648_v21  ;;  %v4680_v21 = vpack.c.bf16 %v2859_v18, %v2858_v17 }
 0x382   : > { %4651 = vmatprep.subr.bf16.mxu0 %v4650_v7  ;;  %v4682_v7 = vpack.c.bf16 %v2877_v1, %v2876_v19 }
 0x384   : > { %4212 = vmatmul.mubr.msk.f32.vlgmr.msra.gmra.mrb[0].mxu1 %vm519_vm5, %v2716_v2 }
 0x385   : > { %4653 = vmatpush3.bf16.msra.mxu0 %v4652_v26  ;;  %v2878_v26 = vld [vmem:[%s6085_s5 + $0x1c0] sm:$0xff] }
 0x386   : > { %4655 = vmatprep.subr.bf16.mxu0 %v4654_v28  ;;  %v4686_v28 = vpack.c.bf16 %v2879_v24, %v2878_v26 }
 0x389   : > { %4657 = vmatpush3.bf16.msra.mxu0 %v4656_v32  ;;  %v2880_v32 = vld [vmem:[%s6085_s5 + $0x1d0] sm:$0xff] }
 0x38a   : > { %4659 = vmatprep.subr.bf16.mxu0 %v4658_v35  ;;  %v4690_v35 = vpack.c.bf16 %v2881_v33, %v2880_v32 }
 0x38d   : > { %4661 = vmatpush3.bf16.msra.mxu0 %v4660_v39  ;;  %v2882_v39 = vld [vmem:[%s6085_s5 + $0x1e0] sm:$0xff] }
 0x38e   : > { %4663 = vmatprep.subr.bf16.mxu0 %v4662_v41  ;;  %v4694_v41 = vpack.c.bf16 %v2883_v38, %v2882_v39 }
 0x391   : > { %4665 = vmatpush3.bf16.msra.mxu0 %v4664_v48  ;;  %v2884_v48 = vld [vmem:[%s6085_s5 + $0x1f0] sm:$0xff] }
 0x392   : > { %4667 = vmatprep.subr.bf16.mxu0 %v4666_v51  ;;  %v4698_v51 = vpack.c.bf16 %v2885_v4, %v2884_v48 }
 0x395   : > { %4669 = vmatpush3.bf16.msra.mxu0 %v4668_v44  ;;  %v4700_v44 = vpack.c.bf16 %v2869_v5, %v2868_v43 }
 0x396   : > { %4671 = vmatprep.subr.bf16.mxu0 %v4670_v54 }
 0x42a   : > { %v3928_v40 = vpop.f32.mrb[8].mxu0 }
 0x42b   : > { %v1411_v55 = vpop.f32.mrb[9].mxu0 }
 0x457   : > { %v4213_v20 = vpop.f32.mrb[0].mxu1 }
 0x458   : > { %v4702_v52 = vadd.f32 %v4213_v20, %v3928_v40  ;;  %v2785_v57 = vpop.f32.mrb[1].mxu1 }
 0x459   : > { %v4703_v58 = vadd.f32 %v2785_v57, %v1411_v55  ;;  %v2821_v57 = vld [vmem:[%s6086_s6] sm:$0x1] }
 0x45a   : > { %v2801_v59 = vrot.slane %v4702_v52, 4 }
 0x45b   : > { %v2797_v60 = vrot.slane %v4703_v58, 4 }
 0x45c   : > { %v2803_v25 = vmax.f32 %v4702_v52, %v2801_v59 }
 0x45d   : > { %v2799_v61 = vmax.f32 %v4703_v58, %v2797_v60 }
 0x45f   : > { %v2804_v0 = vmax.f32 %v2799_v61, %v2803_v25 }
 0x461   : > { %v2812_v2 = vadd.f32 %v3355_v63, %v2804_v0 }
 0x463   : > { %v5940_v56 = vmax.f32 %v2812_v2, 0.0 }
 0x465   : > { %v2815_v6 = vrot.slane %v5940_v56, 1  ;;  %v2819_v62 = vrot.slane %v5940_v56, 3  ;;  %v2817_v53 = vrot.slane %v5940_v56, 2 }
 0x467   : > { %2950 = vmatprep.mubr.f32.mxu0 %v2815_v6 }
 0x468   : > { %2951 = vmatmul.mubr.f32.vlgmr.msra.gmra.mrb[10].mxu0 %v5940_v56 }
 0x469   : > { %4673 = vmatpush3.bf16.msra.mxu0 %v4672_v36  ;;  %3020 = vmatprep.mubr.f32.mxu0 %v2819_v62 }
 0x46a   : > { %4675 = vmatprep.subr.bf16.mxu0 %v4674_v8 }
 0x46d   : > { %4677 = vmatpush3.bf16.msra.mxu0 %v4676_v14 }
 0x46e   : > { %4679 = vmatprep.subr.bf16.mxu0 %v4678_v15 }
 0x471   : > { %4681 = vmatpush3.bf16.msra.mxu0 %v4680_v21 }
 0x472   : > { %4683 = vmatprep.subr.bf16.mxu0 %v4682_v7 }
 0x475   : > { %4685 = vmatpush3.bf16.msra.mxu0 %v4684_v27 }
 0x476   : > { %4687 = vmatprep.subr.bf16.mxu0 %v4686_v28 }
 0x479   : > { %4689 = vmatpush3.bf16.msra.mxu0 %v4688_v47 }
 0x47a   : > { %4691 = vmatprep.subr.bf16.mxu0 %v4690_v35 }
 0x47d   : > { %4693 = vmatpush3.bf16.msra.mxu0 %v4692_v42 }
 0x47e   : > { %4695 = vmatprep.subr.bf16.mxu0 %v4694_v41 }
 0x481   : > { %4697 = vmatpush3.bf16.msra.mxu0 %v4696_v49 }
 0x482   : > { %4699 = vmatprep.subr.bf16.mxu0 %v4698_v51 }
 0x485   : > { %4701 = vmatpush3.bf16.msra.mxu0 %v4700_v44 }
 0x488   : > { %3021 = vmatmul.mubr.f32.vlgmr.msra.gmra.mrb[12].mxu0 %v2817_v53 }
 0x53b   : > { %v3663_v29 = vpop.f32.mrb[10].mxu0 }
 0x53c   : > { %v3664_v54 = vpop.f32.mrb[11].mxu0 }
 0x53d   : > { %v3665_v40 = vadd.f32 %v3664_v54, %v3663_v29 }
 0x55b   : > { %v3698_v55 = vpop.f32.mrb[12].mxu0 }
 0x55c   : > { %v3699_v20 = vpop.f32.mrb[13].mxu0 }
 0x55d   : > { %v3700_v52 = vadd.f32 %v3699_v20, %v3698_v55 }
 0x55f   : > { %v3023_v58 = vadd.f32 %v3700_v52, %v3665_v40 }
 0x561   : > { %v3026_v59 = vadd.f32 %v3023_v58, %v2821_v57 }
 0x563   : > { %3028 = vst.msk [vmem:[%s270_s13] sm:$0x1] %vm3027_vm6, %v3026_v59 }
 0x564   : > { %4806 = shalt.err (!%p4803_p3)
}
 0x565   : > { %s4807_s16 = scalar_lea.hbm %s6038_s22, 16  ;;  %s4811_s19 = scalar_lea.hbm %s6087_s7, 32 }
 0x566   : > { %p4808_p4 = scmp.ne.s32.totalorder %s6038_s22, %s4807_s16  ;;  %p4812_p9 = scmp.lt.u32.totalorder %s6038_s22, %s6087_s7 }
 0x567   : > { %p4813_p10 = scmp.lt.u32.totalorder %s4811_s19, %s4807_s16  ;;  %p4815_p12 = scmp.lt.u32.totalorder %s4807_s16, %s6038_s22 }
 0x568   : > { %p4809_p7 = pnand %p4808_p4, %p4940_p5 }
 0x569   : > { %p4814_p11 = por %p4813_p10, %p4812_p9 }
 0x56a   : > { %p4810_p8 = pneg %p4809_p7 }
 0x56b   : > { %p4816_p13 = por %p4815_p12, %p4814_p11 }
 0x56d   : > { %p4817_p0 = pnand %p4816_p13, %p4810_p8 }
 0x56f   : > { %4820 = shalt.err (!%p4817_p0)
}
 0x570   : > { %4750 = dma.vmem_to_hbm [thread:$0]  (%p4940_p5), %s6040_s15, 16, %s6038_s22, %s3030_s23  }
 0x571 PF: > { %p4756_p1 = scmp.ge.s32.totalorder %s4855_s27, 2  ;;  %s3054_s8 = sand.u32 1, %s4843_s24  }
 0x572   : > { %s3055_s21 = scalar_lea.sflag [#allocation4], %s3054_s8 }
 0x573   : > { %p4753_p2 = pnand %p4756_p1, %p4944_p6 }
 0x575   : > { %4838 = dma.done.wait (!%p4753_p2), %s3055_s21, 16  }
 0x576   : > { %4840 = vsyncadd (!%p4753_p2), %s3055_s21, 4294967280  ;;  %p17_p3 = scmp.ge.s32.totalorder %s4927_s30, 4   ;;  %s6090_s24 = smov %s4847_s25 }
 0x577   : > { %s6091_s25 = smov %s4851_s26  ;;  %s6092_s26 = smov %s4938_s10 }
 0x578   : > { %s6093_s27 = smov %s4927_s30  ;;  %19 = sbr.rel (!%p17_p3) target bundleno = 3 (0x3), region = 110 }
 0x57f   :  { %3059 = vsyncpa [#allocation4], 1 }
 0x580   :  { %3061 = vsyncpa [#allocation4 + $0x1], 1 }

</bundles_post_ra>
